<compile_context>
chip_gen: v6e
topology: v6e:2x2x1
jax: 0.10.0
libtpu: 0.0.40
codegen_flags: <defaults>
</compile_context>

<pallas_src>
import jax
import jax.numpy as jnp
import numpy as np
from jax import lax
from jax.experimental import pallas as pl
from jax.experimental.pallas import tpu as pltpu


def _round_up(x, m):
    return (x + m - 1) // m * m


def _pad_gate_cols(w, H, Hp):
    """(rows, 3H) -> (rows, 3Hp): each of the [r, z, n] blocks zero-padded to Hp."""
    rows = w.shape[0]
    return jnp.pad(w.reshape(rows, 3, H), ((0, 0), (0, 0), (0, Hp - H))).reshape(rows, 3 * Hp)


def gru_kernel(gi_ref, whh_ref, bhn_ref, out_ref, h_scr):
    """One grid step == one chunk of Tc timesteps. Hidden state carried in VMEM."""
    Tc, Bp, Hp = out_ref.shape

    @pl.when(pl.program_id(0) == 0)
    def _():
        h_scr[...] = jnp.zeros_like(h_scr)

    whh = whh_ref[...]                                     # (Hp, 3Hp) resident weights
    bhn = jnp.broadcast_to(bhn_ref[...], (Bp, Hp))         # hoisted broadcast (not in loop)

    def step(s, h):
        gi = gi_ref[s]                                     # (Bp, 3Hp)  (biases pre-folded)
        gh = jnp.dot(h, whh, preferred_element_type=jnp.float32)   # (Bp, 3Hp) recurrence matmul
        r = jax.nn.sigmoid(gi[:, 0 * Hp:1 * Hp] + gh[:, 0 * Hp:1 * Hp])
        z = jax.nn.sigmoid(gi[:, 1 * Hp:2 * Hp] + gh[:, 1 * Hp:2 * Hp])
        n = jnp.tanh(gi[:, 2 * Hp:3 * Hp] + r * (gh[:, 2 * Hp:3 * Hp] + bhn))
        h_new = (1.0 - z) * n + z * h
        out_ref[s] = h_new.astype(out_ref.dtype)           # lane-dense (Bp, Hp) store
        return h_new

    h_scr[...] = lax.fori_loop(0, Tc, step, h_scr[...], unroll=True)


def gru_forward(x_btd, w_ih, w_hh, b_ih, b_hh, *, time_chunk=8):
    """x_btd: (B, T, Din) batch-first (PyTorch convention). Returns (out_bth, hn)."""
    B, T, Din = x_btd.shape
    H = w_ih.shape[0] // 3
    dtype = x_btd.dtype

    Bp = _round_up(B, 8)         # sublane alignment (fp32)
    Hp = _round_up(H, 128)       # lane alignment
    Tc = min(time_chunk, T)
    Tp = _round_up(T, Tc)

    # ---- parameter prep: per-gate lane-aligned padding -----------------------
    wih_t = _pad_gate_cols(jnp.transpose(w_ih), H, Hp)               # (Din, 3Hp)
    whh_t = _pad_gate_cols(jnp.transpose(w_hh), H, Hp)               # (H,   3Hp)
    whh_t = jnp.pad(whh_t, ((0, Hp - H), (0, 0)))                    # (Hp,  3Hp)

    # Fold b_ih entirely and the r/z parts of b_hh into the input projection;
    # only b_hn must stay inside the r*(...) term of the recurrence.
    bias_fold = b_ih + jnp.concatenate([b_hh[:2 * H], jnp.zeros((H,), b_hh.dtype)])
    bias_fold = _pad_gate_cols(bias_fold[None, :], H, Hp)            # (1, 3Hp)
    bhn = jnp.pad(b_hh[2 * H:][None, :], ((0, 0), (0, Hp - H)))      # (1, Hp)

    # ---- input projection hoisted out of the recurrence (one big MXU matmul) -
    x_pad = jnp.pad(x_btd, ((0, Bp - B), (0, 0), (0, 0)))            # (Bp, T, Din)
    gi = jnp.einsum('btd,dg->tbg', x_pad, wih_t,
                    precision=jax.lax.Precision.HIGHEST) + bias_fold[None]
    gi = jnp.pad(gi, ((0, Tp - T), (0, 0), (0, 0))).astype(dtype)    # (Tp, Bp, 3Hp)

    out_tbh = pl.pallas_call(
        gru_kernel,
        out_shape=jax.ShapeDtypeStruct((Tp, Bp, Hp), dtype),
        grid_spec=pltpu.PrefetchScalarGridSpec(
            num_scalar_prefetch=0,
            grid=(Tp // Tc,),
            in_specs=[
                pl.BlockSpec((Tc, Bp, 3 * Hp), lambda c: (c, 0, 0)),   # gi time chunk
                pl.BlockSpec((Hp, 3 * Hp), lambda c: (0, 0)),          # W_hh^T (resident)
                pl.BlockSpec((1, Hp), lambda c: (0, 0)),               # b_hn   (resident)
            ],
            out_specs=pl.BlockSpec((Tc, Bp, Hp), lambda c: (c, 0, 0)),
            scratch_shapes=[pltpu.VMEM((Bp, Hp), jnp.float32)],        # hidden-state carry
        ),
        compiler_params=pltpu.CompilerParams(
            dimension_semantics=("arbitrary",)),                       # time is sequential
    )(gi, whh_t, bhn)

    out_bth = jnp.transpose(out_tbh[:T, :B, :H], (1, 0, 2))            # (B, T, H)
    hn = out_bth[:, -1, :]                                             # h_n == last output
    return out_bth, hn


if __name__ == "__main__":
    key = jax.random.PRNGKey(0)
    B, T, Din, H = 4, 16, 16, 32
    k1, k2, k3, k4, k5 = jax.random.split(key, 5)

    # "list of sequences" input, all length T (packed/unpacked trivially).
    x = jax.random.normal(k1, (B, T, Din), jnp.float32)

    # Deterministic parameter init mimicking torch.nn.GRU: U(-1/sqrt(H), 1/sqrt(H)).
    bound = 1.0 / float(np.sqrt(H))
    w_ih = jax.random.uniform(k2, (3 * H, Din), jnp.float32, -bound, bound)
    w_hh = jax.random.uniform(k3, (3 * H, H), jnp.float32, -bound, bound)
    b_ih = jax.random.uniform(k4, (3 * H,), jnp.float32, -bound, bound)
    b_hh = jax.random.uniform(k5, (3 * H,), jnp.float32, -bound, bound)

    out_bth, hn_last = gru_forward(x, w_ih, w_hh, b_ih, b_hh, time_chunk=8)
    out_bth = jax.block_until_ready(out_bth)
    hn_last = jax.block_until_ready(hn_last)

    # Module return convention: (list of per-sequence outputs, hn of shape (num_layers, B, H)).
    out_list = [out_bth[b] for b in range(B)]
    hn = hn_last[None]

    # Pure-JAX reference (lax.scan) for correctness.
    def ref(x_btd):
        def step(h, x_t):
            gi = jnp.dot(x_t, w_ih.T, precision=jax.lax.Precision.HIGHEST) + b_ih
            gh = jnp.dot(h, w_hh.T, precision=jax.lax.Precision.HIGHEST) + b_hh
            r = jax.nn.sigmoid(gi[:, :H] + gh[:, :H])
            z = jax.nn.sigmoid(gi[:, H:2 * H] + gh[:, H:2 * H])
            n = jnp.tanh(gi[:, 2 * H:] + r * gh[:, 2 * H:])
            h_new = (1.0 - z) * n + z * h
            return h_new, h_new
        h0 = jnp.zeros((B, H), jnp.float32)
        h_final, outs = lax.scan(step, h0, jnp.transpose(x_btd, (1, 0, 2)))
        return jnp.transpose(outs, (1, 0, 2)), h_final

    out_exp, hn_exp = ref(x)
    assert np.allclose(np.asarray(out_bth), np.asarray(out_exp), atol=2e-5, rtol=2e-5)
    assert np.allclose(np.asarray(hn[0]), np.asarray(hn_exp), atol=2e-5, rtol=2e-5)
    assert len(out_list) == B and out_list[0].shape == (T, H) and hn.shape == (1, B, H)

    print("KERNEL_OK")
</pallas_src>

<mosaic_0001>
module attributes {stable_mosaic.version = 11 : i64} {
  func.func @gru_kernel(%arg0: i32, %arg1: memref<8x8x384xf32, #tpu.memory_space<vmem>>, %arg2: memref<128x384xf32, #tpu.memory_space<vmem>>, %arg3: memref<1x128xf32, #tpu.memory_space<vmem>>, %arg4: memref<8x8x128xf32, #tpu.memory_space<vmem>>, %arg5: memref<8x128xf32, #tpu.memory_space<vmem>>) attributes {dimension_semantics = [#tpu.dimension_semantics<arbitrary>], iteration_bounds = array<i64: 2>, scalar_prefetch = 0 : i64, scratch_operands = 1 : i64, tpu.core_type = #tpu.core_type<tc>, window_params = [{transform_indices = @transform_0, window_bounds = array<i64: 8, 8, 384>}, {pipeline_mode = #tpu.pipeline_mode<synchronous>, transform_indices = @transform_1, window_bounds = array<i64: 128, 384>}, {pipeline_mode = #tpu.pipeline_mode<synchronous>, transform_indices = @transform_2, window_bounds = array<i64: 1, 128>}, {transform_indices = @transform_3, window_bounds = array<i64: 8, 8, 128>}]} {
    %c0_i32 = arith.constant 0 : i32
    %0 = arith.cmpi eq, %arg0, %c0_i32 : i32
    %1 = arith.extui %0 : i1 to i32
    %c0_i32_0 = arith.constant 0 : i32
    %2 = arith.cmpi ne, %1, %c0_i32_0 : i32
    scf.if %2 {
      %cst_72 = arith.constant 0.000000e+00 : f32
      %289 = vector.broadcast %cst_72 : f32 to vector<8x128xf32>
      %c0_73 = arith.constant 0 : index
      %c0_74 = arith.constant 0 : index
      %290 = vector.load %arg5[%c0_73, %c0_74] : memref<8x128xf32, #tpu.memory_space<vmem>>, vector<8x128xf32>
      tpu.vector_store %arg5[%c0_73, %c0_74], %289 {strides = array<i32>} : memref<8x128xf32, #tpu.memory_space<vmem>>, vector<8x128xf32>,
    } else {
    }
    %c0 = arith.constant 0 : index
    %c0_1 = arith.constant 0 : index
    %3 = vector.load %arg2[%c0, %c0_1] : memref<128x384xf32, #tpu.memory_space<vmem>>, vector<128x384xf32>
    %c0_2 = arith.constant 0 : index
    %c0_3 = arith.constant 0 : index
    %4 = vector.load %arg3[%c0_2, %c0_3] : memref<1x128xf32, #tpu.memory_space<vmem>>, vector<1x128xf32>
    %5 = vector.shape_cast %4 : vector<1x128xf32> to vector<1x128xf32>
    %6 = vector.broadcast %5 : vector<1x128xf32> to vector<8x128xf32>
    %c0_4 = arith.constant 0 : index
    %c0_5 = arith.constant 0 : index
    %7 = vector.load %arg5[%c0_4, %c0_5] : memref<8x128xf32, #tpu.memory_space<vmem>>, vector<8x128xf32>
    %c0_i32_6 = arith.constant 0 : i32
    %8 = arith.index_cast %c0_i32_6 : i32 to index
    %c0_7 = arith.constant 0 : index
    %c0_8 = arith.constant 0 : index
    %9 = vector.load %arg1[%8, %c0_7, %c0_8] : memref<8x8x384xf32, #tpu.memory_space<vmem>>, vector<1x8x384xf32>
    %10 = vector.shape_cast %9 : vector<1x8x384xf32> to vector<8x384xf32>
    %cst = arith.constant dense<0.000000e+00> : vector<8x384xf32>
    %11 = tpu.matmul %7, %3, %cst {dimension_numbers = #tpu.dot_dimension_numbers<[1], [0], [0], [1], [0, 0, 1, 1], [], []>} : vector<8x128xf32>, vector<128x384xf32>, vector<8x384xf32> -> vector<8x384xf32>
    %12 = vector.extract_strided_slice %10 {offsets = [0, 0], sizes = [8, 128], strides = [1, 1]} : vector<8x384xf32> to vector<8x128xf32>
    %13 = vector.extract_strided_slice %11 {offsets = [0, 0], sizes = [8, 128], strides = [1, 1]} : vector<8x384xf32> to vector<8x128xf32>
    %14 = arith.addf %12, %13 : vector<8x128xf32>
    %15 = arith.negf %14 : vector<8x128xf32>
    %16 = math.exp %15 : vector<8x128xf32>
    %cst_9 = arith.constant 1.000000e+00 : f32
    %17 = vector.broadcast %cst_9 : f32 to vector<8x128xf32>
    %18 = arith.addf %17, %16 : vector<8x128xf32>
    %19 = arith.divf %17, %18 : vector<8x128xf32>
    %20 = vector.extract_strided_slice %10 {offsets = [0, 128], sizes = [8, 128], strides = [1, 1]} : vector<8x384xf32> to vector<8x128xf32>
    %21 = vector.extract_strided_slice %11 {offsets = [0, 128], sizes = [8, 128], strides = [1, 1]} : vector<8x384xf32> to vector<8x128xf32>
    %22 = arith.addf %20, %21 : vector<8x128xf32>
    %23 = arith.negf %22 : vector<8x128xf32>
    %24 = math.exp %23 : vector<8x128xf32>
    %cst_10 = arith.constant 1.000000e+00 : f32
    %25 = vector.broadcast %cst_10 : f32 to vector<8x128xf32>
    %26 = arith.addf %25, %24 : vector<8x128xf32>
    %27 = arith.divf %25, %26 : vector<8x128xf32>
    %28 = vector.extract_strided_slice %10 {offsets = [0, 256], sizes = [8, 128], strides = [1, 1]} : vector<8x384xf32> to vector<8x128xf32>
    %29 = vector.extract_strided_slice %11 {offsets = [0, 256], sizes = [8, 128], strides = [1, 1]} : vector<8x384xf32> to vector<8x128xf32>
    %30 = arith.addf %29, %6 : vector<8x128xf32>
    %31 = arith.mulf %19, %30 : vector<8x128xf32>
    %32 = arith.addf %28, %31 : vector<8x128xf32>
    %33 = math.tanh %32 : vector<8x128xf32>
    %cst_11 = arith.constant 1.000000e+00 : f32
    %34 = vector.broadcast %cst_11 : f32 to vector<8x128xf32>
    %35 = arith.subf %34, %27 : vector<8x128xf32>
    %36 = arith.mulf %35, %33 : vector<8x128xf32>
    %37 = arith.mulf %27, %7 : vector<8x128xf32>
    %38 = arith.addf %36, %37 : vector<8x128xf32>
    %39 = arith.index_cast %c0_i32_6 : i32 to index
    %c0_12 = arith.constant 0 : index
    %c0_13 = arith.constant 0 : index
    %40 = vector.load %arg4[%39, %c0_12, %c0_13] : memref<8x8x128xf32, #tpu.memory_space<vmem>>, vector<1x8x128xf32>
    %41 = vector.shape_cast %40 : vector<1x8x128xf32> to vector<8x128xf32>
    %42 = vector.shape_cast %38 : vector<8x128xf32> to vector<1x8x128xf32>
    tpu.vector_store %arg4[%39, %c0_12, %c0_13], %42 {strides = array<i32>} : memref<8x8x128xf32, #tpu.memory_space<vmem>>, vector<1x8x128xf32>,
    %c1_i32 = arith.constant 1 : i32
    %43 = arith.index_cast %c1_i32 : i32 to index
    %c0_14 = arith.constant 0 : index
    %c0_15 = arith.constant 0 : index
    %44 = vector.load %arg1[%43, %c0_14, %c0_15] : memref<8x8x384xf32, #tpu.memory_space<vmem>>, vector<1x8x384xf32>
    %45 = vector.shape_cast %44 : vector<1x8x384xf32> to vector<8x384xf32>
    %cst_16 = arith.constant dense<0.000000e+00> : vector<8x384xf32>
    %46 = tpu.matmul %38, %3, %cst_16 {dimension_numbers = #tpu.dot_dimension_numbers<[1], [0], [0], [1], [0, 0, 1, 1], [], []>} : vector<8x128xf32>, vector<128x384xf32>, vector<8x384xf32> -> vector<8x384xf32>
    %47 = vector.extract_strided_slice %45 {offsets = [0, 0], sizes = [8, 128], strides = [1, 1]} : vector<8x384xf32> to vector<8x128xf32>
    %48 = vector.extract_strided_slice %46 {offsets = [0, 0], sizes = [8, 128], strides = [1, 1]} : vector<8x384xf32> to vector<8x128xf32>
    %49 = arith.addf %47, %48 : vector<8x128xf32>
    %50 = arith.negf %49 : vector<8x128xf32>
    %51 = math.exp %50 : vector<8x128xf32>
    %cst_17 = arith.constant 1.000000e+00 : f32
    %52 = vector.broadcast %cst_17 : f32 to vector<8x128xf32>
    %53 = arith.addf %52, %51 : vector<8x128xf32>
    %54 = arith.divf %52, %53 : vector<8x128xf32>
    %55 = vector.extract_strided_slice %45 {offsets = [0, 128], sizes = [8, 128], strides = [1, 1]} : vector<8x384xf32> to vector<8x128xf32>
    %56 = vector.extract_strided_slice %46 {offsets = [0, 128], sizes = [8, 128], strides = [1, 1]} : vector<8x384xf32> to vector<8x128xf32>
    %57 = arith.addf %55, %56 : vector<8x128xf32>
    %58 = arith.negf %57 : vector<8x128xf32>
    %59 = math.exp %58 : vector<8x128xf32>
    %cst_18 = arith.constant 1.000000e+00 : f32
    %60 = vector.broadcast %cst_18 : f32 to vector<8x128xf32>
    %61 = arith.addf %60, %59 : vector<8x128xf32>
    %62 = arith.divf %60, %61 : vector<8x128xf32>
    %63 = vector.extract_strided_slice %45 {offsets = [0, 256], sizes = [8, 128], strides = [1, 1]} : vector<8x384xf32> to vector<8x128xf32>
    %64 = vector.extract_strided_slice %46 {offsets = [0, 256], sizes = [8, 128], strides = [1, 1]} : vector<8x384xf32> to vector<8x128xf32>
    %65 = arith.addf %64, %6 : vector<8x128xf32>
    %66 = arith.mulf %54, %65 : vector<8x128xf32>
    %67 = arith.addf %63, %66 : vector<8x128xf32>
    %68 = math.tanh %67 : vector<8x128xf32>
    %cst_19 = arith.constant 1.000000e+00 : f32
    %69 = vector.broadcast %cst_19 : f32 to vector<8x128xf32>
    %70 = arith.subf %69, %62 : vector<8x128xf32>
    %71 = arith.mulf %70, %68 : vector<8x128xf32>
    %72 = arith.mulf %62, %38 : vector<8x128xf32>
    %73 = arith.addf %71, %72 : vector<8x128xf32>
    %74 = arith.index_cast %c1_i32 : i32 to index
    %c0_20 = arith.constant 0 : index
    %c0_21 = arith.constant 0 : index
    %75 = vector.load %arg4[%74, %c0_20, %c0_21] : memref<8x8x128xf32, #tpu.memory_space<vmem>>, vector<1x8x128xf32>
    %76 = vector.shape_cast %75 : vector<1x8x128xf32> to vector<8x128xf32>
    %77 = vector.shape_cast %73 : vector<8x128xf32> to vector<1x8x128xf32>
    tpu.vector_store %arg4[%74, %c0_20, %c0_21], %77 {strides = array<i32>} : memref<8x8x128xf32, #tpu.memory_space<vmem>>, vector<1x8x128xf32>,
    %c2_i32 = arith.constant 2 : i32
    %78 = arith.index_cast %c2_i32 : i32 to index
    %c0_22 = arith.constant 0 : index
    %c0_23 = arith.constant 0 : index
    %79 = vector.load %arg1[%78, %c0_22, %c0_23] : memref<8x8x384xf32, #tpu.memory_space<vmem>>, vector<1x8x384xf32>
    %80 = vector.shape_cast %79 : vector<1x8x384xf32> to vector<8x384xf32>
    %cst_24 = arith.constant dense<0.000000e+00> : vector<8x384xf32>
    %81 = tpu.matmul %73, %3, %cst_24 {dimension_numbers = #tpu.dot_dimension_numbers<[1], [0], [0], [1], [0, 0, 1, 1], [], []>} : vector<8x128xf32>, vector<128x384xf32>, vector<8x384xf32> -> vector<8x384xf32>
    %82 = vector.extract_strided_slice %80 {offsets = [0, 0], sizes = [8, 128], strides = [1, 1]} : vector<8x384xf32> to vector<8x128xf32>
    %83 = vector.extract_strided_slice %81 {offsets = [0, 0], sizes = [8, 128], strides = [1, 1]} : vector<8x384xf32> to vector<8x128xf32>
    %84 = arith.addf %82, %83 : vector<8x128xf32>
    %85 = arith.negf %84 : vector<8x128xf32>
    %86 = math.exp %85 : vector<8x128xf32>
    %cst_25 = arith.constant 1.000000e+00 : f32
    %87 = vector.broadcast %cst_25 : f32 to vector<8x128xf32>
    %88 = arith.addf %87, %86 : vector<8x128xf32>
    %89 = arith.divf %87, %88 : vector<8x128xf32>
    %90 = vector.extract_strided_slice %80 {offsets = [0, 128], sizes = [8, 128], strides = [1, 1]} : vector<8x384xf32> to vector<8x128xf32>
    %91 = vector.extract_strided_slice %81 {offsets = [0, 128], sizes = [8, 128], strides = [1, 1]} : vector<8x384xf32> to vector<8x128xf32>
    %92 = arith.addf %90, %91 : vector<8x128xf32>
    %93 = arith.negf %92 : vector<8x128xf32>
    %94 = math.exp %93 : vector<8x128xf32>
    %cst_26 = arith.constant 1.000000e+00 : f32
    %95 = vector.broadcast %cst_26 : f32 to vector<8x128xf32>
    %96 = arith.addf %95, %94 : vector<8x128xf32>
    %97 = arith.divf %95, %96 : vector<8x128xf32>
    %98 = vector.extract_strided_slice %80 {offsets = [0, 256], sizes = [8, 128], strides = [1, 1]} : vector<8x384xf32> to vector<8x128xf32>
    %99 = vector.extract_strided_slice %81 {offsets = [0, 256], sizes = [8, 128], strides = [1, 1]} : vector<8x384xf32> to vector<8x128xf32>
    %100 = arith.addf %99, %6 : vector<8x128xf32>
    %101 = arith.mulf %89, %100 : vector<8x128xf32>
    %102 = arith.addf %98, %101 : vector<8x128xf32>
    %103 = math.tanh %102 : vector<8x128xf32>
    %cst_27 = arith.constant 1.000000e+00 : f32
    %104 = vector.broadcast %cst_27 : f32 to vector<8x128xf32>
    %105 = arith.subf %104, %97 : vector<8x128xf32>
    %106 = arith.mulf %105, %103 : vector<8x128xf32>
    %107 = arith.mulf %97, %73 : vector<8x128xf32>
    %108 = arith.addf %106, %107 : vector<8x128xf32>
    %109 = arith.index_cast %c2_i32 : i32 to index
    %c0_28 = arith.constant 0 : index
    %c0_29 = arith.constant 0 : index
    %110 = vector.load %arg4[%109, %c0_28, %c0_29] : memref<8x8x128xf32, #tpu.memory_space<vmem>>, vector<1x8x128xf32>
    %111 = vector.shape_cast %110 : vector<1x8x128xf32> to vector<8x128xf32>
    %112 = vector.shape_cast %108 : vector<8x128xf32> to vector<1x8x128xf32>
    tpu.vector_store %arg4[%109, %c0_28, %c0_29], %112 {strides = array<i32>} : memref<8x8x128xf32, #tpu.memory_space<vmem>>, vector<1x8x128xf32>,
    %c3_i32 = arith.constant 3 : i32
    %113 = arith.index_cast %c3_i32 : i32 to index
    %c0_30 = arith.constant 0 : index
    %c0_31 = arith.constant 0 : index
    %114 = vector.load %arg1[%113, %c0_30, %c0_31] : memref<8x8x384xf32, #tpu.memory_space<vmem>>, vector<1x8x384xf32>
    %115 = vector.shape_cast %114 : vector<1x8x384xf32> to vector<8x384xf32>
    %cst_32 = arith.constant dense<0.000000e+00> : vector<8x384xf32>
    %116 = tpu.matmul %108, %3, %cst_32 {dimension_numbers = #tpu.dot_dimension_numbers<[1], [0], [0], [1], [0, 0, 1, 1], [], []>} : vector<8x128xf32>, vector<128x384xf32>, vector<8x384xf32> -> vector<8x384xf32>
    %117 = vector.extract_strided_slice %115 {offsets = [0, 0], sizes = [8, 128], strides = [1, 1]} : vector<8x384xf32> to vector<8x128xf32>
    %118 = vector.extract_strided_slice %116 {offsets = [0, 0], sizes = [8, 128], strides = [1, 1]} : vector<8x384xf32> to vector<8x128xf32>
    %119 = arith.addf %117, %118 : vector<8x128xf32>
    %120 = arith.negf %119 : vector<8x128xf32>
    %121 = math.exp %120 : vector<8x128xf32>
    %cst_33 = arith.constant 1.000000e+00 : f32
    %122 = vector.broadcast %cst_33 : f32 to vector<8x128xf32>
    %123 = arith.addf %122, %121 : vector<8x128xf32>
    %124 = arith.divf %122, %123 : vector<8x128xf32>
    %125 = vector.extract_strided_slice %115 {offsets = [0, 128], sizes = [8, 128], strides = [1, 1]} : vector<8x384xf32> to vector<8x128xf32>
    %126 = vector.extract_strided_slice %116 {offsets = [0, 128], sizes = [8, 128], strides = [1, 1]} : vector<8x384xf32> to vector<8x128xf32>
    %127 = arith.addf %125, %126 : vector<8x128xf32>
    %128 = arith.negf %127 : vector<8x128xf32>
    %129 = math.exp %128 : vector<8x128xf32>
    %cst_34 = arith.constant 1.000000e+00 : f32
    %130 = vector.broadcast %cst_34 : f32 to vector<8x128xf32>
    %131 = arith.addf %130, %129 : vector<8x128xf32>
    %132 = arith.divf %130, %131 : vector<8x128xf32>
    %133 = vector.extract_strided_slice %115 {offsets = [0, 256], sizes = [8, 128], strides = [1, 1]} : vector<8x384xf32> to vector<8x128xf32>
    %134 = vector.extract_strided_slice %116 {offsets = [0, 256], sizes = [8, 128], strides = [1, 1]} : vector<8x384xf32> to vector<8x128xf32>
    %135 = arith.addf %134, %6 : vector<8x128xf32>
    %136 = arith.mulf %124, %135 : vector<8x128xf32>
    %137 = arith.addf %133, %136 : vector<8x128xf32>
    %138 = math.tanh %137 : vector<8x128xf32>
    %cst_35 = arith.constant 1.000000e+00 : f32
    %139 = vector.broadcast %cst_35 : f32 to vector<8x128xf32>
    %140 = arith.subf %139, %132 : vector<8x128xf32>
    %141 = arith.mulf %140, %138 : vector<8x128xf32>
    %142 = arith.mulf %132, %108 : vector<8x128xf32>
    %143 = arith.addf %141, %142 : vector<8x128xf32>
    %144 = arith.index_cast %c3_i32 : i32 to index
    %c0_36 = arith.constant 0 : index
    %c0_37 = arith.constant 0 : index
    %145 = vector.load %arg4[%144, %c0_36, %c0_37] : memref<8x8x128xf32, #tpu.memory_space<vmem>>, vector<1x8x128xf32>
    %146 = vector.shape_cast %145 : vector<1x8x128xf32> to vector<8x128xf32>
    %147 = vector.shape_cast %143 : vector<8x128xf32> to vector<1x8x128xf32>
    tpu.vector_store %arg4[%144, %c0_36, %c0_37], %147 {strides = array<i32>} : memref<8x8x128xf32, #tpu.memory_space<vmem>>, vector<1x8x128xf32>,
    %c4_i32 = arith.constant 4 : i32
    %148 = arith.index_cast %c4_i32 : i32 to index
    %c0_38 = arith.constant 0 : index
    %c0_39 = arith.constant 0 : index
    %149 = vector.load %arg1[%148, %c0_38, %c0_39] : memref<8x8x384xf32, #tpu.memory_space<vmem>>, vector<1x8x384xf32>
    %150 = vector.shape_cast %149 : vector<1x8x384xf32> to vector<8x384xf32>
    %cst_40 = arith.constant dense<0.000000e+00> : vector<8x384xf32>
    %151 = tpu.matmul %143, %3, %cst_40 {dimension_numbers = #tpu.dot_dimension_numbers<[1], [0], [0], [1], [0, 0, 1, 1], [], []>} : vector<8x128xf32>, vector<128x384xf32>, vector<8x384xf32> -> vector<8x384xf32>
    %152 = vector.extract_strided_slice %150 {offsets = [0, 0], sizes = [8, 128], strides = [1, 1]} : vector<8x384xf32> to vector<8x128xf32>
    %153 = vector.extract_strided_slice %151 {offsets = [0, 0], sizes = [8, 128], strides = [1, 1]} : vector<8x384xf32> to vector<8x128xf32>
    %154 = arith.addf %152, %153 : vector<8x128xf32>
    %155 = arith.negf %154 : vector<8x128xf32>
    %156 = math.exp %155 : vector<8x128xf32>
    %cst_41 = arith.constant 1.000000e+00 : f32
    %157 = vector.broadcast %cst_41 : f32 to vector<8x128xf32>
    %158 = arith.addf %157, %156 : vector<8x128xf32>
    %159 = arith.divf %157, %158 : vector<8x128xf32>
    %160 = vector.extract_strided_slice %150 {offsets = [0, 128], sizes = [8, 128], strides = [1, 1]} : vector<8x384xf32> to vector<8x128xf32>
    %161 = vector.extract_strided_slice %151 {offsets = [0, 128], sizes = [8, 128], strides = [1, 1]} : vector<8x384xf32> to vector<8x128xf32>
    %162 = arith.addf %160, %161 : vector<8x128xf32>
    %163 = arith.negf %162 : vector<8x128xf32>
    %164 = math.exp %163 : vector<8x128xf32>
    %cst_42 = arith.constant 1.000000e+00 : f32
    %165 = vector.broadcast %cst_42 : f32 to vector<8x128xf32>
    %166 = arith.addf %165, %164 : vector<8x128xf32>
    %167 = arith.divf %165, %166 : vector<8x128xf32>
    %168 = vector.extract_strided_slice %150 {offsets = [0, 256], sizes = [8, 128], strides = [1, 1]} : vector<8x384xf32> to vector<8x128xf32>
    %169 = vector.extract_strided_slice %151 {offsets = [0, 256], sizes = [8, 128], strides = [1, 1]} : vector<8x384xf32> to vector<8x128xf32>
    %170 = arith.addf %169, %6 : vector<8x128xf32>
    %171 = arith.mulf %159, %170 : vector<8x128xf32>
    %172 = arith.addf %168, %171 : vector<8x128xf32>
    %173 = math.tanh %172 : vector<8x128xf32>
    %cst_43 = arith.constant 1.000000e+00 : f32
    %174 = vector.broadcast %cst_43 : f32 to vector<8x128xf32>
    %175 = arith.subf %174, %167 : vector<8x128xf32>
    %176 = arith.mulf %175, %173 : vector<8x128xf32>
    %177 = arith.mulf %167, %143 : vector<8x128xf32>
    %178 = arith.addf %176, %177 : vector<8x128xf32>
    %179 = arith.index_cast %c4_i32 : i32 to index
    %c0_44 = arith.constant 0 : index
    %c0_45 = arith.constant 0 : index
    %180 = vector.load %arg4[%179, %c0_44, %c0_45] : memref<8x8x128xf32, #tpu.memory_space<vmem>>, vector<1x8x128xf32>
    %181 = vector.shape_cast %180 : vector<1x8x128xf32> to vector<8x128xf32>
    %182 = vector.shape_cast %178 : vector<8x128xf32> to vector<1x8x128xf32>
    tpu.vector_store %arg4[%179, %c0_44, %c0_45], %182 {strides = array<i32>} : memref<8x8x128xf32, #tpu.memory_space<vmem>>, vector<1x8x128xf32>,
    %c5_i32 = arith.constant 5 : i32
    %183 = arith.index_cast %c5_i32 : i32 to index
    %c0_46 = arith.constant 0 : index
    %c0_47 = arith.constant 0 : index
    %184 = vector.load %arg1[%183, %c0_46, %c0_47] : memref<8x8x384xf32, #tpu.memory_space<vmem>>, vector<1x8x384xf32>
    %185 = vector.shape_cast %184 : vector<1x8x384xf32> to vector<8x384xf32>
    %cst_48 = arith.constant dense<0.000000e+00> : vector<8x384xf32>
    %186 = tpu.matmul %178, %3, %cst_48 {dimension_numbers = #tpu.dot_dimension_numbers<[1], [0], [0], [1], [0, 0, 1, 1], [], []>} : vector<8x128xf32>, vector<128x384xf32>, vector<8x384xf32> -> vector<8x384xf32>
    %187 = vector.extract_strided_slice %185 {offsets = [0, 0], sizes = [8, 128], strides = [1, 1]} : vector<8x384xf32> to vector<8x128xf32>
    %188 = vector.extract_strided_slice %186 {offsets = [0, 0], sizes = [8, 128], strides = [1, 1]} : vector<8x384xf32> to vector<8x128xf32>
    %189 = arith.addf %187, %188 : vector<8x128xf32>
    %190 = arith.negf %189 : vector<8x128xf32>
    %191 = math.exp %190 : vector<8x128xf32>
    %cst_49 = arith.constant 1.000000e+00 : f32
    %192 = vector.broadcast %cst_49 : f32 to vector<8x128xf32>
    %193 = arith.addf %192, %191 : vector<8x128xf32>
    %194 = arith.divf %192, %193 : vector<8x128xf32>
    %195 = vector.extract_strided_slice %185 {offsets = [0, 128], sizes = [8, 128], strides = [1, 1]} : vector<8x384xf32> to vector<8x128xf32>
    %196 = vector.extract_strided_slice %186 {offsets = [0, 128], sizes = [8, 128], strides = [1, 1]} : vector<8x384xf32> to vector<8x128xf32>
    %197 = arith.addf %195, %196 : vector<8x128xf32>
    %198 = arith.negf %197 : vector<8x128xf32>
    %199 = math.exp %198 : vector<8x128xf32>
    %cst_50 = arith.constant 1.000000e+00 : f32
    %200 = vector.broadcast %cst_50 : f32 to vector<8x128xf32>
    %201 = arith.addf %200, %199 : vector<8x128xf32>
    %202 = arith.divf %200, %201 : vector<8x128xf32>
    %203 = vector.extract_strided_slice %185 {offsets = [0, 256], sizes = [8, 128], strides = [1, 1]} : vector<8x384xf32> to vector<8x128xf32>
    %204 = vector.extract_strided_slice %186 {offsets = [0, 256], sizes = [8, 128], strides = [1, 1]} : vector<8x384xf32> to vector<8x128xf32>
    %205 = arith.addf %204, %6 : vector<8x128xf32>
    %206 = arith.mulf %194, %205 : vector<8x128xf32>
    %207 = arith.addf %203, %206 : vector<8x128xf32>
    %208 = math.tanh %207 : vector<8x128xf32>
    %cst_51 = arith.constant 1.000000e+00 : f32
    %209 = vector.broadcast %cst_51 : f32 to vector<8x128xf32>
    %210 = arith.subf %209, %202 : vector<8x128xf32>
    %211 = arith.mulf %210, %208 : vector<8x128xf32>
    %212 = arith.mulf %202, %178 : vector<8x128xf32>
    %213 = arith.addf %211, %212 : vector<8x128xf32>
    %214 = arith.index_cast %c5_i32 : i32 to index
    %c0_52 = arith.constant 0 : index
    %c0_53 = arith.constant 0 : index
    %215 = vector.load %arg4[%214, %c0_52, %c0_53] : memref<8x8x128xf32, #tpu.memory_space<vmem>>, vector<1x8x128xf32>
    %216 = vector.shape_cast %215 : vector<1x8x128xf32> to vector<8x128xf32>
    %217 = vector.shape_cast %213 : vector<8x128xf32> to vector<1x8x128xf32>
    tpu.vector_store %arg4[%214, %c0_52, %c0_53], %217 {strides = array<i32>} : memref<8x8x128xf32, #tpu.memory_space<vmem>>, vector<1x8x128xf32>,
    %c6_i32 = arith.constant 6 : i32
    %218 = arith.index_cast %c6_i32 : i32 to index
    %c0_54 = arith.constant 0 : index
    %c0_55 = arith.constant 0 : index
    %219 = vector.load %arg1[%218, %c0_54, %c0_55] : memref<8x8x384xf32, #tpu.memory_space<vmem>>, vector<1x8x384xf32>
    %220 = vector.shape_cast %219 : vector<1x8x384xf32> to vector<8x384xf32>
    %cst_56 = arith.constant dense<0.000000e+00> : vector<8x384xf32>
    %221 = tpu.matmul %213, %3, %cst_56 {dimension_numbers = #tpu.dot_dimension_numbers<[1], [0], [0], [1], [0, 0, 1, 1], [], []>} : vector<8x128xf32>, vector<128x384xf32>, vector<8x384xf32> -> vector<8x384xf32>
    %222 = vector.extract_strided_slice %220 {offsets = [0, 0], sizes = [8, 128], strides = [1, 1]} : vector<8x384xf32> to vector<8x128xf32>
    %223 = vector.extract_strided_slice %221 {offsets = [0, 0], sizes = [8, 128], strides = [1, 1]} : vector<8x384xf32> to vector<8x128xf32>
    %224 = arith.addf %222, %223 : vector<8x128xf32>
    %225 = arith.negf %224 : vector<8x128xf32>
    %226 = math.exp %225 : vector<8x128xf32>
    %cst_57 = arith.constant 1.000000e+00 : f32
    %227 = vector.broadcast %cst_57 : f32 to vector<8x128xf32>
    %228 = arith.addf %227, %226 : vector<8x128xf32>
    %229 = arith.divf %227, %228 : vector<8x128xf32>
    %230 = vector.extract_strided_slice %220 {offsets = [0, 128], sizes = [8, 128], strides = [1, 1]} : vector<8x384xf32> to vector<8x128xf32>
    %231 = vector.extract_strided_slice %221 {offsets = [0, 128], sizes = [8, 128], strides = [1, 1]} : vector<8x384xf32> to vector<8x128xf32>
    %232 = arith.addf %230, %231 : vector<8x128xf32>
    %233 = arith.negf %232 : vector<8x128xf32>
    %234 = math.exp %233 : vector<8x128xf32>
    %cst_58 = arith.constant 1.000000e+00 : f32
    %235 = vector.broadcast %cst_58 : f32 to vector<8x128xf32>
    %236 = arith.addf %235, %234 : vector<8x128xf32>
    %237 = arith.divf %235, %236 : vector<8x128xf32>
    %238 = vector.extract_strided_slice %220 {offsets = [0, 256], sizes = [8, 128], strides = [1, 1]} : vector<8x384xf32> to vector<8x128xf32>
    %239 = vector.extract_strided_slice %221 {offsets = [0, 256], sizes = [8, 128], strides = [1, 1]} : vector<8x384xf32> to vector<8x128xf32>
    %240 = arith.addf %239, %6 : vector<8x128xf32>
    %241 = arith.mulf %229, %240 : vector<8x128xf32>
    %242 = arith.addf %238, %241 : vector<8x128xf32>
    %243 = math.tanh %242 : vector<8x128xf32>
    %cst_59 = arith.constant 1.000000e+00 : f32
    %244 = vector.broadcast %cst_59 : f32 to vector<8x128xf32>
    %245 = arith.subf %244, %237 : vector<8x128xf32>
    %246 = arith.mulf %245, %243 : vector<8x128xf32>
    %247 = arith.mulf %237, %213 : vector<8x128xf32>
    %248 = arith.addf %246, %247 : vector<8x128xf32>
    %249 = arith.index_cast %c6_i32 : i32 to index
    %c0_60 = arith.constant 0 : index
    %c0_61 = arith.constant 0 : index
    %250 = vector.load %arg4[%249, %c0_60, %c0_61] : memref<8x8x128xf32, #tpu.memory_space<vmem>>, vector<1x8x128xf32>
    %251 = vector.shape_cast %250 : vector<1x8x128xf32> to vector<8x128xf32>
    %252 = vector.shape_cast %248 : vector<8x128xf32> to vector<1x8x128xf32>
    tpu.vector_store %arg4[%249, %c0_60, %c0_61], %252 {strides = array<i32>} : memref<8x8x128xf32, #tpu.memory_space<vmem>>, vector<1x8x128xf32>,
    %c7_i32 = arith.constant 7 : i32
    %253 = arith.index_cast %c7_i32 : i32 to index
    %c0_62 = arith.constant 0 : index
    %c0_63 = arith.constant 0 : index
    %254 = vector.load %arg1[%253, %c0_62, %c0_63] : memref<8x8x384xf32, #tpu.memory_space<vmem>>, vector<1x8x384xf32>
    %255 = vector.shape_cast %254 : vector<1x8x384xf32> to vector<8x384xf32>
    %cst_64 = arith.constant dense<0.000000e+00> : vector<8x384xf32>
    %256 = tpu.matmul %248, %3, %cst_64 {dimension_numbers = #tpu.dot_dimension_numbers<[1], [0], [0], [1], [0, 0, 1, 1], [], []>} : vector<8x128xf32>, vector<128x384xf32>, vector<8x384xf32> -> vector<8x384xf32>
    %257 = vector.extract_strided_slice %255 {offsets = [0, 0], sizes = [8, 128], strides = [1, 1]} : vector<8x384xf32> to vector<8x128xf32>
    %258 = vector.extract_strided_slice %256 {offsets = [0, 0], sizes = [8, 128], strides = [1, 1]} : vector<8x384xf32> to vector<8x128xf32>
    %259 = arith.addf %257, %258 : vector<8x128xf32>
    %260 = arith.negf %259 : vector<8x128xf32>
    %261 = math.exp %260 : vector<8x128xf32>
    %cst_65 = arith.constant 1.000000e+00 : f32
    %262 = vector.broadcast %cst_65 : f32 to vector<8x128xf32>
    %263 = arith.addf %262, %261 : vector<8x128xf32>
    %264 = arith.divf %262, %263 : vector<8x128xf32>
    %265 = vector.extract_strided_slice %255 {offsets = [0, 128], sizes = [8, 128], strides = [1, 1]} : vector<8x384xf32> to vector<8x128xf32>
    %266 = vector.extract_strided_slice %256 {offsets = [0, 128], sizes = [8, 128], strides = [1, 1]} : vector<8x384xf32> to vector<8x128xf32>
    %267 = arith.addf %265, %266 : vector<8x128xf32>
    %268 = arith.negf %267 : vector<8x128xf32>
    %269 = math.exp %268 : vector<8x128xf32>
    %cst_66 = arith.constant 1.000000e+00 : f32
    %270 = vector.broadcast %cst_66 : f32 to vector<8x128xf32>
    %271 = arith.addf %270, %269 : vector<8x128xf32>
    %272 = arith.divf %270, %271 : vector<8x128xf32>
    %273 = vector.extract_strided_slice %255 {offsets = [0, 256], sizes = [8, 128], strides = [1, 1]} : vector<8x384xf32> to vector<8x128xf32>
    %274 = vector.extract_strided_slice %256 {offsets = [0, 256], sizes = [8, 128], strides = [1, 1]} : vector<8x384xf32> to vector<8x128xf32>
    %275 = arith.addf %274, %6 : vector<8x128xf32>
    %276 = arith.mulf %264, %275 : vector<8x128xf32>
    %277 = arith.addf %273, %276 : vector<8x128xf32>
    %278 = math.tanh %277 : vector<8x128xf32>
    %cst_67 = arith.constant 1.000000e+00 : f32
    %279 = vector.broadcast %cst_67 : f32 to vector<8x128xf32>
    %280 = arith.subf %279, %272 : vector<8x128xf32>
    %281 = arith.mulf %280, %278 : vector<8x128xf32>
    %282 = arith.mulf %272, %248 : vector<8x128xf32>
    %283 = arith.addf %281, %282 : vector<8x128xf32>
    %284 = arith.index_cast %c7_i32 : i32 to index
    %c0_68 = arith.constant 0 : index
    %c0_69 = arith.constant 0 : index
    %285 = vector.load %arg4[%284, %c0_68, %c0_69] : memref<8x8x128xf32, #tpu.memory_space<vmem>>, vector<1x8x128xf32>
    %286 = vector.shape_cast %285 : vector<1x8x128xf32> to vector<8x128xf32>
    %287 = vector.shape_cast %283 : vector<8x128xf32> to vector<1x8x128xf32>
    tpu.vector_store %arg4[%284, %c0_68, %c0_69], %287 {strides = array<i32>} : memref<8x8x128xf32, #tpu.memory_space<vmem>>, vector<1x8x128xf32>,
    %c8_i32 = arith.constant 8 : i32
    %c0_70 = arith.constant 0 : index
    %c0_71 = arith.constant 0 : index
    %288 = vector.load %arg5[%c0_70, %c0_71] : memref<8x128xf32, #tpu.memory_space<vmem>>, vector<8x128xf32>
    tpu.vector_store %arg5[%c0_70, %c0_71], %283 {strides = array<i32>} : memref<8x128xf32, #tpu.memory_space<vmem>>, vector<8x128xf32>,
    return
  }
  func.func @transform_0(%arg0: i32) -> (i32, i32, i32) {
    %c0_i32 = arith.constant 0 : i32
    %c0_i32_0 = arith.constant 0 : i32
    %c0_i32_1 = arith.constant 0 : i32
    return %arg0, %c0_i32, %c0_i32_0 : i32, i32, i32
  }
  func.func @transform_1(%arg0: i32) -> (i32, i32) {
    %c0_i32 = arith.constant 0 : i32
    %c0_i32_0 = arith.constant 0 : i32
    %c0_i32_1 = arith.constant 0 : i32
    return %c0_i32, %c0_i32_0 : i32, i32
  }
  func.func @transform_2(%arg0: i32) -> (i32, i32) {
    %c0_i32 = arith.constant 0 : i32
    %c0_i32_0 = arith.constant 0 : i32
    %c0_i32_1 = arith.constant 0 : i32
    return %c0_i32, %c0_i32_0 : i32, i32
  }
  func.func @transform_3(%arg0: i32) -> (i32, i32, i32) {
    %c0_i32 = arith.constant 0 : i32
    %c0_i32_0 = arith.constant 0 : i32
    %c0_i32_1 = arith.constant 0 : i32
    return %arg0, %c0_i32, %c0_i32_0 : i32, i32, i32
  }
}

</mosaic_0001>

<bundles_post_ra>
// kernel: tpu_custom_call.1
= control target key start
LH: loop header
LB: loop body
LE: loop exit
PB: predicated region body
PF: predicated region fallthrough
CT: control target
= control target key end

     0   :  { %8 = vsyncpa [#allocation4], 0  ;;  %s3551_s0 = inlined_call_operand.hbm [shape: f32[16,8,384], index: 0, kind: input, shape index: {}]   ;;  %s3552_s1 = inlined_call_operand.hbm [shape: f32[128,384], index: 1, kind: input, shape index: {}]   ;;  %s3553_s2 = inlined_call_operand.vmem [shape: f32[1,128], index: 2, kind: input, shape index: {}]   ;;  %s3554_s3 = inlined_call_operand.hbm [shape: f32[16,8,128], index: 3, kind: output, shape index: {}]  }
   0x1   :  { %10 = vsyncpa [#allocation4 + $0x1], 0 }
   0x2   :  { %11 = vsyncpa [#allocation7], 0 }
   0x3   :  { %12 = vsyncpa [#allocation5], 0 }
   0x4   :  { %14 = vsyncpa [#allocation5 + $0x1], 0  ;;  %s2544_s12 = smov 0   ;;  %s2546_s13 = smov 0  }
   0x5   :  { %s2548_s14 = smov 0   ;;  %s2550_s15 = smov 0  }
   0x6 LB: > { %s2565_s16 = sadd.s32 4294967295, %s2512_s15   ;;  %s1716_s17 = sadd.s32 4294967294, %s2512_s15   ;;  %s2512_s15 = sphi %s2550_s15, %s3609_s15   ;;  %s2508_s14 = sphi %s2548_s14, %s3608_s14   ;;  %s2504_s13 = sphi %s2546_s13, %s3607_s13   ;;  %s2500_s12 = sphi %s2544_s12, %s3606_s12  }
   0x7   : > { %p40_p0 = scmp.ne.s32.totalorder %s2504_s13, %s2500_s12  ;;  %p3555_p1 = scmp.eq.s32.totalorder %s2565_s16, 0 }
   0x8   : > { %p112_p3 = scmp.eq.s32.totalorder %s1716_s17, 1  ;;  %p1717_p5 = scmp.ge.s32.totalorder %s2512_s15, 1 }
   0x9   : > { %p2574_p4 = por %p3555_p1, %p40_p0  ;;  %p119_p7 = scmp.lt.s32.totalorder %s2512_s15, 3 }
   0xa   : > { %p2579_p6 = por %p112_p3, %p40_p0  ;;  %s2514_s21 = smov [#allocation6]  }
   0xb   : > { %s3572_s18 = scalar_select %p2574_p4, 1, 0 }
   0xc   : > { %s3573_s19 = scalar_select %p2579_p6, 1, 0 }
   0xd   : > { %p2585_p9 = pnand %p1717_p5, %p119_p7  ;;  %s131_s22 = sshll.u32 %s2514_s21, 4  ;;  %s132_s22 = int_to_ptr.vmem [resolvable:$true] %s131_s22 }
   0xe   : > { %s2599_s24 = sadd.s32 1, %s2512_s15   ;;  %s27_s25 = sadd.s32 1, %s2508_s14 }
   0xf   : > { %s3574_s20 = scalar_select %p2585_p9, 1, 0 }
  0x10   : > { %p2205_p10 = pneg %p2585_p9  ;;  %s24_s26 = ssub.s32 %s2512_s15, %s2599_s24 }
  0x11   : > { %s2401_s27 = scalar_lea.vmem %s132_s22, 6144  ;;  %p2409_p7 = scmp.lt.s32.totalorder %s132_s22, %s132_s22 }
  0x12   : > { %p2594_p12 = pnand %p2205_p10, %p3555_p1  ;;  %p2402_p0 = scmp.ne.s32.totalorder %s132_s22, %s2401_s27 }
  0x13   : > { %p2410_p8 = scmp.lt.s32.totalorder %s2401_s27, %s2401_s27 }
  0x14   : > { %p2392_p13 = pneg %p2594_p12 }
  0x15   : > { %p2411_p11 = por %p2410_p8, %p2409_p7 }
  0x16   : > { %p2404_p3 = pnand %p2402_p0, %p2392_p13 }
  0x18   : > { %p2405_p5 = pneg %p2404_p3 }
  0x1a   : > { %p2412_p2 = pnand %p2411_p11, %p2405_p5 }
  0x1c   : > { %2415 = shalt.err (!%p2412_p2)
}
  0x1d   : > { %s2515_s28 = smov 384   ;;  %s2516_s29 = smov 24  }
  0x1e   : > { %2208 = dma.hbm_to_vmem [thread:$0]  (!%p2594_p12), %s3552_s1, 6144, %s132_s22, [#allocation7], %s2515_s28, %s2515_s28, %s2516_s29  }
  0x1f   : > { %p25_p2 = scmp.eq.s32.totalorder %s24_s26, 0  ;;  %p34_p8 = scmp.ne.s32.totalorder %s2508_s14, %s2504_s13 }
  0x20   : > { %p35_p10 = scmp.eq.s32.totalorder %s2512_s15, 0  ;;  %p2218_p11 = scmp.lt.s32.totalorder %s2512_s15, 2 }
  0x21   : > { %s2619_s5 = scalar_select %p25_p2, %s2508_s14, %s27_s25  }
  0x22   : > { %p36_p13 = por %p35_p10, %p34_p8  ;;  %p3576_p0 = scmp.eq.s32.totalorder %s2565_s16, 1 }
  0x23   : > { %s148_s7 = sand.u32 1, %s2508_s14   ;;  %s2195_s8 = smul.u32 3072, %s2512_s15 }
  0x24   : > { %p2623_p3 = por %p3576_p0, %p34_p8  ;;  %s2194_s9 = smul.u32 192, %s148_s7 }
  0x25   : > { %p2629_p5 = pnand %p2218_p11, %p36_p13  ;;  %s2636_s21 = scalar_lea.hbm %s3551_s0, %s2195_s8 }
  0x26   : > { %s3577_s6 = scalar_select %p2623_p3, 1, 0 }
  0x27   : > { %s152_s22 = scalar_lea.vmem [#allocation3], %s2194_s9  ;;  %s2640_s25 = scalar_lea.sflag [#allocation4], %s148_s7 }
  0x28   : > { %s160_s23 = sshll.u32 %s152_s22, 4  ;;  %s2416_s26 = scalar_lea.hbm %s2636_s21, 3072  ;;  %s2638_s23 = int_to_ptr.vmem [resolvable:$true] %s160_s23 }
  0x29   : > { %p2417_p12 = scmp.ne.s32.totalorder %s2636_s21, %s2416_s26  ;;  %p2418_p7 = pneg %p2629_p5 }
  0x2a   : > { %s2421_s4 = scalar_lea.hbm %s3551_s0, 6144  ;;  %p2422_p10 = scmp.lt.s32.totalorder %s2636_s21, %s3551_s0 }
  0x2b   : > { %p2419_p2 = pnand %p2418_p7, %p2417_p12  ;;  %p2423_p11 = scmp.lt.s32.totalorder %s2421_s4, %s2416_s26 }
  0x2d   : > { %p2420_p8 = pneg %p2419_p2  ;;  %p2424_p13 = por %p2423_p11, %p2422_p10 }
  0x2f   : > { %p2425_p0 = pnand %p2424_p13, %p2420_p8 }
  0x31   : > { %2428 = shalt.err (!%p2425_p0)
}
  0x32   : > { %s2429_s7 = scalar_lea.vmem %s2638_s23, 3072  ;;  %s2517_s9 = smov [#allocation3]  }
  0x33   : > { %p2430_p1 = scmp.ne.s32.totalorder %s2638_s23, %s2429_s7  ;;  %s2434_s17 = sshll.u32 %s2517_s9, 4  ;;  %s2435_s17 = int_to_ptr.vmem [resolvable:$false] %s2434_s17 }
  0x34   : > { %s2436_s22 = scalar_lea.vmem %s2435_s17, 6144  ;;  %p2437_p2 = scmp.lt.s32.totalorder %s2638_s23, %s2435_s17 }
  0x35   : > { %p2432_p6 = pnand %p2430_p1, %p2418_p7  ;;  %p2438_p3 = scmp.lt.s32.totalorder %s2436_s22, %s2429_s7 }
  0x37   : > { %p2433_p12 = pneg %p2432_p6  ;;  %p2439_p4 = por %p2438_p3, %p2437_p2 }
  0x39   : > { %p2440_p9 = pnand %p2439_p4, %p2433_p12 }
  0x3b   : > { %2443 = shalt.err (!%p2440_p9)
}
  0x3c   : > { %2212 = dma.hbm_to_vmem [thread:$0]  (!%p2629_p5), %s2636_s21, 3072, %s2638_s23, %s2640_s25, %s2515_s28, %s2515_s28, %s2516_s29  }
  0x3d   : > { %p3579_p1 = scmp.ne.s32.totalorder %s3574_s20, 0 }
  0x3f   : > { %172 = sbr.rel (%p3579_p1) target bundleno = 2124 (0x84c), region = 32 }
  0x44   : > { %s2667_s26 = sand.u32 1, %s2504_s13   ;;  %p3580_p4 = scmp.ne.s32.totalorder %s3572_s18, 0 }
  0x45   : > { %s2196_s27 = smul.u32 192, %s2667_s26  ;;  %s175_s30 = scalar_lea.sflag [#allocation4], %s2667_s26 }
  0x47   : > { %s2671_s4 = scalar_lea.vmem [#allocation3], %s2196_s27 }
  0x48   : > { %2487 = dma.done.wait (%p3580_p4), %s175_s30, 3072  }
  0x49   : > { %2489 = vsyncadd (%p3580_p4), %s175_s30, 4294964224  ;;  %p3581_p6 = scmp.eq.s32.totalorder %s2565_s16, 0 }
  0x4b   : > { %2491 = dma.done.wait (%p3581_p6), [#allocation7], 6144   ;;  %p3582_p9 = pmov %p3581_p6 }
  0x4c   : > { %s1725_s20 = sshll.u32 %s2667_s26, 6  ;;  %p3583_p3 = scmp.ne.s32.totalorder %s2565_s16, 0 }
  0x4d   : > { %2493 = vsyncadd (%p3582_p9), [#allocation7], 4294961152  ;;  %s2682_s28 = scalar_lea.vmem [#allocation8], %s1725_s20 }
  0x4e   : > { %210 = sbr.rel (%p3583_p3) target bundleno = 85 (0x55), region = 44 }
  0x53   : > { %v2518_v0 = vmov 0.0  }
  0x54   : > { %211 = vst [vmem:[#allocation2] sm:$0xff] %v2518_v0 }
  0x55 PF: > { %v2686_v1 = vld [vmem:[#allocation6 + $0x170] sm:$0xff]  ;;  %v2688_v2 = vld [vmem:[#allocation6 + $0x168] sm:$0xff]  ;;  %v2690_v3 = vld [vmem:[#allocation6 + $0x158] sm:$0xff]  ;;  %v3559_v5 = vmov 0.0   ;;  %vm2520_vm0 = vmmov 0   ;;  %s1777_s23 = sshll.u32 %s2565_s16, 10 }
  0x56   : > { %3584 = vst [vmem:[#allocation12_spill] sm:$0xff] %v2686_v1  ;;  %271 = vmatprep.subr.mxu0 %v2686_v1  ;;  %v2693_v4 = vld [vmem:[#allocation6 + $0x150] sm:$0xff]  ;;  %1914 = vmatprep.subr.mxu1 %v3559_v5  ;;  %v2697_v6 = vld [vmem:[#allocation6 + $0x140] sm:$0xff]  ;;  %v2701_v7 = vld [vmem:[#allocation6 + $0x138] sm:$0xff]  ;;  %s1633_s25 = sshll.u32 %s2682_s28, 4  ;;  %s3505_s7 = scalar_lea.hbm %s3554_s3, %s1777_s23  ;;  %s3507_s25 = int_to_ptr.vmem [resolvable:$true] %s1633_s25 }
  0x57   : > { %272 = vmatpush1.msra.mxu0 %v2688_v2  ;;  %335 = vmatprep.mubr.f32.mxu0 %v3559_v5  ;;  %v2706_v8 = vld [vmem:[#allocation6 + $0x128] sm:$0xff]  ;;  %v2709_v9 = vld [vmem:[#allocation6 + $0x120] sm:$0xff]  ;;  %v2712_v10 = vld [vmem:[#allocation6 + $0x110] sm:$0xff]  ;;  %s1620_s9 = scalar_lea.sflag [#allocation5], %s2667_s26  ;;  %s2444_s17 = scalar_lea.vmem %s3507_s25, 1024 }
  0x58   : > { %273 = vmatprep.subr.mxu0 %v2690_v3  ;;  %1946 = vmatprep.mubr.msk.f32.mxu1 %vm2520_vm0, %v3559_v5  ;;  %v2715_v11 = vld [vmem:[#allocation6 + $0x108] sm:$0xff]  ;;  %v2718_v12 = vld [vmem:[#allocation6 + $0xf8] sm:$0xff]  ;;  %v2721_v13 = vld [vmem:[#allocation6 + $0xf0] sm:$0xff]  ;;  %p2445_p5 = scmp.ne.s32.totalorder %s3507_s25, %s2444_s17  ;;  %p3603_p7 = scmp.ne.s32.totalorder %s3577_s6, 0 }
  0x59   : > { %274 = vmatpush1.msra.mxu0 %v2693_v4  ;;  %v2724_v14 = vld [vmem:[#allocation6 + $0xe0] sm:$0xff]  ;;  %v2726_v15 = vld [vmem:[#allocation6 + $0x178] sm:$0xff]  ;;  %v2735_v18 = vld [vmem:[#allocation6 + $0xc8] sm:$0xff]  ;;  %s2521_s16 = smov [#allocation8]  }
  0x5a   : > { %275 = vmatprep.subr.mxu0 %v2697_v6  ;;  %v2729_v16 = vld [vmem:[#allocation6 + $0xd8] sm:$0xff]  ;;  %1915 = vmatpush3.msra.mxu1 %v2726_v15  ;;  %v2732_v17 = vld [vmem:[#allocation6 + $0x160] sm:$0xff]  ;;  %v2738_v19 = vld [vmem:[#allocation6 + $0x148] sm:$0xff]  ;;  %p2446_p8 = pnand %p2445_p5, %p3603_p7  ;;  %s2448_s22 = sshll.u32 %s2521_s16, 4  ;;  %s2449_s22 = int_to_ptr.vmem [resolvable:$false] %s2448_s22 }
  0x5b   : > { %276 = vmatpush1.msra.mxu0 %v2701_v7  ;;  %1916 = vmatprep.subr.mxu1 %v3559_v5  ;;  %v2741_v20 = vld [vmem:[#allocation6 + $0xc0] sm:$0xff]  ;;  %v2745_v21 = vld [vmem:[#allocation6 + $0xb0] sm:$0xff]  ;;  %v2751_v23 = vld [vmem:[#allocation6 + $0xa8] sm:$0xff]  ;;  %s2450_s27 = scalar_lea.vmem %s2449_s22, 2048  ;;  %p2451_p11 = scmp.lt.s32.totalorder %s3507_s25, %s2449_s22 }
  0x5c   : > { %277 = vmatprep.subr.mxu0 %v2706_v8  ;;  %1917 = vmatpush3.msra.mxu1 %v2732_v17  ;;  %v2748_v22 = vld [vmem:[#allocation6 + $0x130] sm:$0xff]  ;;  %v2755_v24 = vld [vmem:[#allocation6 + $0x98] sm:$0xff]  ;;  %v2765_v27 = vld [vmem:[#allocation6 + $0x80] sm:$0xff]  ;;  %p2447_p10 = pneg %p2446_p8  ;;  %p2452_p13 = scmp.lt.s32.totalorder %s2450_s27, %s2444_s17 }
  0x5d   : > { %278 = vmatpush1.msra.mxu0 %v2709_v9  ;;  %1918 = vmatprep.subr.mxu1 %v3559_v5  ;;  %v2758_v25 = vld [vmem:[#allocation6 + $0x118] sm:$0xff]  ;;  %v2761_v26 = vld [vmem:[#allocation6 + $0x90] sm:$0xff]  ;;  %v2768_v28 = vld [vmem:[#allocation6 + $0x100] sm:$0xff] }
  0x5e   : > { %279 = vmatprep.subr.mxu0 %v2712_v10  ;;  %1919 = vmatpush3.msra.mxu1 %v2738_v19  ;;  %v2771_v29 = vld [vmem:[#allocation6 + $0x78] sm:$0xff]  ;;  %v2775_v30 = vld [vmem:[#allocation6 + $0x68] sm:$0xff]  ;;  %v2781_v32 = vld [vmem:[#allocation6 + $0x60] sm:$0xff]  ;;  %p2453_p0 = por %p2452_p13, %p2451_p11 }
  0x5f   : > { %280 = vmatpush1.msra.mxu0 %v2715_v11  ;;  %1920 = vmatprep.subr.mxu1 %v3559_v5  ;;  %v2778_v31 = vld [vmem:[#allocation6 + $0xe8] sm:$0xff]  ;;  %v2785_v33 = vld [vmem:[#allocation6 + $0x50] sm:$0xff]  ;;  %v2795_v36 = vld [vmem:[#allocation6 + $0x38] sm:$0xff] }
  0x60   : > { %281 = vmatprep.subr.mxu0 %v2718_v12  ;;  %1921 = vmatpush3.msra.mxu1 %v2748_v22  ;;  %v2788_v34 = vld [vmem:[#allocation6 + $0xd0] sm:$0xff]  ;;  %v2791_v35 = vld [vmem:[#allocation6 + $0x48] sm:$0xff]  ;;  %v2798_v37 = vld [vmem:[#allocation6 + $0xb8] sm:$0xff]  ;;  %p2454_p12 = pnand %p2453_p0, %p2447_p10 }
  0x61   : > { %282 = vmatpush1.msra.mxu0 %v2721_v13  ;;  %1922 = vmatprep.subr.mxu1 %v3559_v5  ;;  %v2801_v38 = vld [vmem:[#allocation6 + $0x30] sm:$0xff]  ;;  %v2805_v39 = vld [vmem:[#allocation6 + $0x20] sm:$0xff]  ;;  %v2811_v41 = vld [vmem:[#allocation6 + $0x18] sm:$0xff] }
  0x62   : > { %283 = vmatprep.subr.mxu0 %v2724_v14  ;;  %1923 = vmatpush3.msra.mxu1 %v2758_v25  ;;  %v2808_v40 = vld [vmem:[#allocation6 + $0xa0] sm:$0xff]  ;;  %v2815_v42 = vld [vmem:[#allocation6 + $0x8] sm:$0xff]  ;;  %v2825_v45 = vld [vmem:[#allocation2] sm:$0xff] }
  0x63   : > { %284 = vmatpush1.msra.mxu0 %v2729_v16  ;;  %1924 = vmatprep.subr.mxu1 %v3559_v5  ;;  %3585 = vst [vmem:[#allocation13_spill] sm:$0xff] %v2815_v42  ;;  %v2818_v43 = vld [vmem:[#allocation6 + $0x88] sm:$0xff]  ;;  %v2821_v44 = vld [vmem:[#allocation6] sm:$0xff]  ;;  %v2828_v46 = vld [vmem:[#allocation6 + $0x70] sm:$0xff] }
  0x64   : > { %285 = vmatprep.subr.mxu0 %v2735_v18  ;;  %1925 = vmatpush3.msra.mxu1 %v2768_v28  ;;  %3586 = vst [vmem:[#allocation14_spill] sm:$0xff] %v2821_v44  ;;  %v2834_v47 = vld [vmem:[#allocation6 + $0x58] sm:$0xff]  ;;  %v2839_v48 = vld [vmem:[#allocation6 + $0x40] sm:$0xff]  ;;  %v2845_v49 = vld [vmem:[#allocation6 + $0x28] sm:$0xff] }
  0x65   : > { %286 = vmatpush1.msra.mxu0 %v2741_v20  ;;  %1926 = vmatprep.subr.mxu1 %v3559_v5  ;;  %v2851_v50 = vld [vmem:[#allocation6 + $0x10] sm:$0xff]  ;;  %v268_v51 = vld [vmem:[%s2671_s4] sm:$0xff]  ;;  %v269_v55 = vld [vmem:[%s2671_s4 + $0x8] sm:$0xff] }
  0x66   : > { %287 = vmatprep.subr.mxu0 %v2745_v21  ;;  %1927 = vmatpush3.msra.mxu1 %v2778_v31  ;;  %3587 = vst [vmem:[#allocation15_spill] sm:$0xff] %v2851_v50  ;;  %v2927_v0 = vld [vmem:[%s3553_s2] ss:$0 sm:$0xff] }
  0x67   : > { %288 = vmatpush1.msra.mxu0 %v2751_v23  ;;  %1928 = vmatprep.subr.mxu1 %v3559_v5 }
  0x68   : > { %289 = vmatprep.subr.mxu0 %v2755_v24  ;;  %1929 = vmatpush3.msra.mxu1 %v2788_v34 }
  0x69   : > { %290 = vmatpush1.msra.mxu0 %v2761_v26  ;;  %1930 = vmatprep.subr.mxu1 %v3559_v5 }
  0x6a   : > { %291 = vmatprep.subr.mxu0 %v2765_v27  ;;  %1931 = vmatpush3.msra.mxu1 %v2798_v37 }
  0x6b   : > { %292 = vmatpush1.msra.mxu0 %v2771_v29  ;;  %1932 = vmatprep.subr.mxu1 %v3559_v5 }
  0x6c   : > { %293 = vmatprep.subr.mxu0 %v2775_v30  ;;  %1933 = vmatpush3.msra.mxu1 %v2808_v40 }
  0x6d   : > { %294 = vmatpush1.msra.mxu0 %v2781_v32  ;;  %1934 = vmatprep.subr.mxu1 %v3559_v5 }
  0x6e   : > { %295 = vmatprep.subr.mxu0 %v2785_v33  ;;  %1935 = vmatpush3.msra.mxu1 %v2818_v43 }
  0x6f   : > { %296 = vmatpush1.msra.mxu0 %v2791_v35  ;;  %1936 = vmatprep.subr.mxu1 %v3559_v5 }
  0x70   : > { %297 = vmatprep.subr.mxu0 %v2795_v36  ;;  %1937 = vmatpush3.msra.mxu1 %v2828_v46 }
  0x71   : > { %298 = vmatpush1.msra.mxu0 %v2801_v38  ;;  %1938 = vmatprep.subr.mxu1 %v3559_v5 }
  0x72   : > { %299 = vmatprep.subr.mxu0 %v2805_v39  ;;  %1939 = vmatpush3.msra.mxu1 %v2834_v47 }
  0x73   : > { %300 = vmatpush1.msra.mxu0 %v2811_v41  ;;  %1940 = vmatprep.subr.mxu1 %v3559_v5 }
  0x74   : > { %301 = vmatprep.subr.mxu0 %v2815_v42  ;;  %1941 = vmatpush3.msra.mxu1 %v2839_v48 }
  0x75   : > { %302 = vmatpush1.msra.mxu0 %v2821_v44  ;;  %1942 = vmatprep.subr.mxu1 %v3559_v5 }
  0x76   : > { %336 = vmatmul.mubr.f32.vlgmr.msra.gmra.mxu0 %v2825_v45  ;;  %439 = vmatprep.subr.mxu0 %v2686_v1 }
  0x77   : > { %440 = vmatpush1.msra.mxu0 %v2688_v2  ;;  %1943 = vmatpush3.msra.mxu1 %v2845_v49 }
  0x78   : > { %441 = vmatprep.subr.mxu0 %v2690_v3  ;;  %1944 = vmatprep.subr.mxu1 %v3559_v5 }
  0x79   : > { %442 = vmatpush1.msra.mxu0 %v2693_v4  ;;  %1945 = vmatpush3.msra.mxu1 %v2851_v50 }
  0x7a   : > { %443 = vmatprep.subr.mxu0 %v2697_v6  ;;  %1947 = vmatmul.mubr.f32.vlgmr.msra.gmra.mxu1 %v2825_v45 }
  0x7b   : > { %444 = vmatpush1.msra.mxu0 %v2701_v7  ;;  %1949 = vmatprep.subr.mxu1 %v3559_v5 }
  0x7c   : > { %445 = vmatprep.subr.mxu0 %v2706_v8  ;;  %1950 = vmatpush3.msra.mxu1 %v2726_v15 }
  0x7d   : > { %446 = vmatpush1.msra.mxu0 %v2709_v9  ;;  %1951 = vmatprep.subr.mxu1 %v3559_v5 }
  0x7e   : > { %447 = vmatprep.subr.mxu0 %v2712_v10  ;;  %1952 = vmatpush3.msra.mxu1 %v2732_v17 }
  0x7f   : > { %448 = vmatpush1.msra.mxu0 %v2715_v11  ;;  %1953 = vmatprep.subr.mxu1 %v3559_v5 }
  0x80   : > { %449 = vmatprep.subr.mxu0 %v2718_v12  ;;  %1954 = vmatpush3.msra.mxu1 %v2738_v19 }
  0x81   : > { %450 = vmatpush1.msra.mxu0 %v2721_v13  ;;  %1955 = vmatprep.subr.mxu1 %v3559_v5 }
  0x82   : > { %451 = vmatprep.subr.mxu0 %v2724_v14  ;;  %1956 = vmatpush3.msra.mxu1 %v2748_v22 }
  0x83   : > { %452 = vmatpush1.msra.mxu0 %v2729_v16  ;;  %1957 = vmatprep.subr.mxu1 %v3559_v5 }
  0x84   : > { %453 = vmatprep.subr.mxu0 %v2735_v18  ;;  %1958 = vmatpush3.msra.mxu1 %v2758_v25 }
  0x85   : > { %454 = vmatpush1.msra.mxu0 %v2741_v20  ;;  %1959 = vmatprep.subr.mxu1 %v3559_v5 }
  0x86   : > { %455 = vmatprep.subr.mxu0 %v2745_v21  ;;  %1960 = vmatpush3.msra.mxu1 %v2768_v28 }
  0x87   : > { %456 = vmatpush1.msra.mxu0 %v2751_v23  ;;  %1961 = vmatprep.subr.mxu1 %v3559_v5 }
  0x88   : > { %457 = vmatprep.subr.mxu0 %v2755_v24  ;;  %1962 = vmatpush3.msra.mxu1 %v2778_v31 }
  0x89   : > { %458 = vmatpush1.msra.mxu0 %v2761_v26  ;;  %1963 = vmatprep.subr.mxu1 %v3559_v5 }
  0x8a   : > { %459 = vmatprep.subr.mxu0 %v2765_v27  ;;  %1964 = vmatpush3.msra.mxu1 %v2788_v34 }
  0x8b   : > { %460 = vmatpush1.msra.mxu0 %v2771_v29  ;;  %1965 = vmatprep.subr.mxu1 %v3559_v5 }
  0x8c   : > { %461 = vmatprep.subr.mxu0 %v2775_v30  ;;  %1966 = vmatpush3.msra.mxu1 %v2798_v37 }
  0x8d   : > { %462 = vmatpush1.msra.mxu0 %v2781_v32  ;;  %1967 = vmatprep.subr.mxu1 %v3559_v5 }
  0x8e   : > { %463 = vmatprep.subr.mxu0 %v2785_v33  ;;  %1968 = vmatpush3.msra.mxu1 %v2808_v40 }
  0x8f   : > { %464 = vmatpush1.msra.mxu0 %v2791_v35  ;;  %1969 = vmatprep.subr.mxu1 %v3559_v5 }
  0x90   : > { %465 = vmatprep.subr.mxu0 %v2795_v36  ;;  %1970 = vmatpush3.msra.mxu1 %v2818_v43 }
  0x91   : > { %466 = vmatpush1.msra.mxu0 %v2801_v38  ;;  %1971 = vmatprep.subr.mxu1 %v3559_v5 }
  0x92   : > { %467 = vmatprep.subr.mxu0 %v2805_v39  ;;  %1972 = vmatpush3.msra.mxu1 %v2828_v46 }
  0x93   : > { %468 = vmatpush1.msra.mxu0 %v2811_v41  ;;  %1973 = vmatprep.subr.mxu1 %v3559_v5 }
  0x94   : > { %469 = vmatprep.subr.mxu0 %v2815_v42  ;;  %1974 = vmatpush3.msra.mxu1 %v2834_v47 }
  0x95   : > { %470 = vmatpush1.msra.mxu0 %v2821_v44  ;;  %503 = vmatprep.mubr.f32.mxu0 %v3559_v5 }
  0x96   : > { %1975 = vmatprep.subr.mxu1 %v3559_v5  ;;  %1981 = vmatprep.mubr.msk.f32.mxu1 %vm2520_vm0, %v3559_v5 }
  0x97   : > { %1976 = vmatpush3.msra.mxu1 %v2839_v48  ;;  %608 = vmatprep.subr.mxu0 %v2686_v1 }
  0x98   : > { %1977 = vmatprep.subr.mxu1 %v3559_v5 }
  0x99   : > { %1978 = vmatpush3.msra.mxu1 %v2845_v49 }
  0x9a   : > { %1979 = vmatprep.subr.mxu1 %v3559_v5 }
  0x9b   : > { %1980 = vmatpush3.msra.mxu1 %v2851_v50 }
  0x9c   : > { %1984 = vmatprep.subr.mxu1 %v3559_v5 }
 0x136   : > { %v337_v52 = vpop.f32.mrf.mxu0 }
 0x137   : > { %v412_v53 = vadd.f32 %v337_v52, %v268_v51 }
 0x138   : > { %v339_v56 = vpop.f32.mrf.mxu0 }
 0x139   : > { %v1728_v54 = vmul.f32 -1.442695, %v412_v53  ;;  %v419_v57 = vadd.f32 %v339_v56, %v269_v55 }
 0x13a   : > { %v408_v58 = vpop.f32.mrf.mxu1 }
 0x13b   : > { %2261 = vpow2.f32 %v1728_v54  ;;  %v1729_v59 = vmul.f32 -1.442695, %v419_v57  ;;  %v426_v52 = vadd.f32 %v2927_v0, %v408_v58  ;;  %v270_v54 = vld [vmem:[%s2671_s4 + $0x10] sm:$0xff]  ;;  %v3588_v58 = vmov 0.0  }
 0x13c   : > { %v1948_v60 = vpop.f32.mrf.mxu1 }
 0x13d   : > { %2263 = vpow2.f32 %v1729_v59 }
 0x148   : > { %v2262_v61 = vpop.eup %2261 }
 0x149   : > { %v416_v62 = vadd.f32 1.0, %v2262_v61 }
 0x14a   : > { %v2264_v63 = vpop.eup %2263 }
 0x14b   : > { %2265 = vrcp.f32 %v416_v62  ;;  %v423_v51 = vadd.f32 1.0, %v2264_v63 }
 0x14d   : > { %2267 = vrcp.f32 %v423_v51 }
 0x158   : > { %v2266_v53 = vpop.eup %2265 }
 0x159   : > { %v427_v55 = vmul.f32 %v2266_v53, %v426_v52 }
 0x15a   : > { %v2268_v57 = vpop.eup %2267 }
 0x15b   : > { %v428_v56 = vadd.f32 %v427_v55, %v270_v54  ;;  %v430_v59 = vsub.f32 1.0, %v2268_v57  ;;  %v432_v62 = vmul.f32 %v2268_v57, %v2825_v45  ;;  %v1730_v45 = vld [vmem:[%s2671_s4 + $0x18] sm:$0xff]  ;;  %v1731_v55 = vld [vmem:[%s2671_s4 + $0x20] sm:$0xff] }
 0x15d   : > { %2269 = vtanh.f32 %v428_v56 }
 0x16a   : > { %v2270_v60 = vpop.eup %2269 }
 0x16b   : > { %v431_v61 = vmul.f32 %v2270_v60, %v430_v59 }
 0x16d   : > { %v2932_v5 = vadd.f32 %v432_v62, %v431_v61 }
 0x16f   : > { %434 = vst [vmem:[%s2682_s28] sm:$0xff] %v2932_v5  ;;  %504 = vmatmul.mubr.f32.vlgmr.msra.gmra.mxu0 %v2932_v5  ;;  %1982 = vmatmul.mubr.f32.vlgmr.msra.gmra.mxu1 %v2932_v5 }
 0x170   : > { %609 = vmatpush1.msra.mxu0 %v2688_v2  ;;  %1985 = vmatpush3.msra.mxu1 %v2726_v15 }
 0x171   : > { %610 = vmatprep.subr.mxu0 %v2690_v3  ;;  %1986 = vmatprep.subr.mxu1 %v3588_v58 }
 0x172   : > { %611 = vmatpush1.msra.mxu0 %v2693_v4  ;;  %1987 = vmatpush3.msra.mxu1 %v2732_v17 }
 0x173   : > { %612 = vmatprep.subr.mxu0 %v2697_v6  ;;  %1988 = vmatprep.subr.mxu1 %v3588_v58 }
 0x174   : > { %613 = vmatpush1.msra.mxu0 %v2701_v7  ;;  %1989 = vmatpush3.msra.mxu1 %v2738_v19 }
 0x175   : > { %614 = vmatprep.subr.mxu0 %v2706_v8  ;;  %1990 = vmatprep.subr.mxu1 %v3588_v58 }
 0x176   : > { %615 = vmatpush1.msra.mxu0 %v2709_v9  ;;  %1991 = vmatpush3.msra.mxu1 %v2748_v22 }
 0x177   : > { %616 = vmatprep.subr.mxu0 %v2712_v10  ;;  %1992 = vmatprep.subr.mxu1 %v3588_v58 }
 0x178   : > { %617 = vmatpush1.msra.mxu0 %v2715_v11  ;;  %1993 = vmatpush3.msra.mxu1 %v2758_v25 }
 0x179   : > { %618 = vmatprep.subr.mxu0 %v2718_v12  ;;  %1994 = vmatprep.subr.mxu1 %v3588_v58 }
 0x17a   : > { %619 = vmatpush1.msra.mxu0 %v2721_v13  ;;  %1995 = vmatpush3.msra.mxu1 %v2768_v28 }
 0x17b   : > { %620 = vmatprep.subr.mxu0 %v2724_v14  ;;  %1996 = vmatprep.subr.mxu1 %v3588_v58 }
 0x17c   : > { %621 = vmatpush1.msra.mxu0 %v2729_v16  ;;  %1997 = vmatpush3.msra.mxu1 %v2778_v31 }
 0x17d   : > { %622 = vmatprep.subr.mxu0 %v2735_v18  ;;  %1998 = vmatprep.subr.mxu1 %v3588_v58 }
 0x17e   : > { %623 = vmatpush1.msra.mxu0 %v2741_v20  ;;  %1999 = vmatpush3.msra.mxu1 %v2788_v34 }
 0x17f   : > { %624 = vmatprep.subr.mxu0 %v2745_v21  ;;  %2000 = vmatprep.subr.mxu1 %v3588_v58 }
 0x180   : > { %625 = vmatpush1.msra.mxu0 %v2751_v23  ;;  %2001 = vmatpush3.msra.mxu1 %v2798_v37 }
 0x181   : > { %626 = vmatprep.subr.mxu0 %v2755_v24  ;;  %2002 = vmatprep.subr.mxu1 %v3588_v58 }
 0x182   : > { %627 = vmatpush1.msra.mxu0 %v2761_v26  ;;  %2003 = vmatpush3.msra.mxu1 %v2808_v40 }
 0x183   : > { %628 = vmatprep.subr.mxu0 %v2765_v27  ;;  %2004 = vmatprep.subr.mxu1 %v3588_v58 }
 0x184   : > { %629 = vmatpush1.msra.mxu0 %v2771_v29  ;;  %2005 = vmatpush3.msra.mxu1 %v2818_v43 }
 0x185   : > { %630 = vmatprep.subr.mxu0 %v2775_v30  ;;  %2006 = vmatprep.subr.mxu1 %v3588_v58 }
 0x186   : > { %631 = vmatpush1.msra.mxu0 %v2781_v32  ;;  %2007 = vmatpush3.msra.mxu1 %v2828_v46 }
 0x187   : > { %632 = vmatprep.subr.mxu0 %v2785_v33  ;;  %2008 = vmatprep.subr.mxu1 %v3588_v58 }
 0x188   : > { %633 = vmatpush1.msra.mxu0 %v2791_v35  ;;  %2009 = vmatpush3.msra.mxu1 %v2834_v47 }
 0x189   : > { %634 = vmatprep.subr.mxu0 %v2795_v36  ;;  %2010 = vmatprep.subr.mxu1 %v3588_v58 }
 0x18a   : > { %635 = vmatpush1.msra.mxu0 %v2801_v38  ;;  %2011 = vmatpush3.msra.mxu1 %v2839_v48 }
 0x18b   : > { %636 = vmatprep.subr.mxu0 %v2805_v39  ;;  %2012 = vmatprep.subr.mxu1 %v3588_v58 }
 0x18c   : > { %637 = vmatpush1.msra.mxu0 %v2811_v41  ;;  %2013 = vmatpush3.msra.mxu1 %v2845_v49 }
 0x18d   : > { %638 = vmatprep.subr.mxu0 %v2815_v42  ;;  %2014 = vmatprep.subr.mxu1 %v3588_v58  ;;  %v1732_v42 = vld [vmem:[%s2671_s4 + $0x28] sm:$0xff] }
 0x18e   : > { %639 = vmatpush1.msra.mxu0 %v2821_v44  ;;  %672 = vmatprep.mubr.f32.mxu0 %v3588_v58 }
 0x18f   : > { %2015 = vmatpush3.msra.mxu1 %v2851_v50  ;;  %2016 = vmatprep.mubr.msk.f32.mxu1 %vm2520_vm0, %v3588_v58 }
 0x190   : > { %777 = vmatprep.subr.mxu0 %v2686_v1  ;;  %2019 = vmatprep.subr.mxu1 %v3588_v58 }
 0x22f   : > { %v505_v63 = vpop.f32.mrf.mxu0  ;;  %v576_v51 = vpop.f32.mrf.mxu1 }
 0x230   : > { %v580_v52 = vadd.f32 %v1730_v45, %v505_v63  ;;  %v594_v50 = vadd.f32 %v2927_v0, %v576_v51 }
 0x231   : > { %v1983_v53 = vpop.f32.mrf.mxu1  ;;  %v507_v56 = vpop.f32.mrf.mxu0 }
 0x232   : > { %v1733_v54 = vmul.f32 -1.442695, %v580_v52  ;;  %v587_v57 = vadd.f32 %v1731_v55, %v507_v56 }
 0x234   : > { %2271 = vpow2.f32 %v1733_v54  ;;  %v1734_v59 = vmul.f32 -1.442695, %v587_v57 }
 0x236   : > { %2273 = vpow2.f32 %v1734_v59 }
 0x241   : > { %v2272_v60 = vpop.eup %2271 }
 0x242   : > { %v584_v61 = vadd.f32 1.0, %v2272_v60 }
 0x243   : > { %v2274_v62 = vpop.eup %2273 }
 0x244   : > { %2275 = vrcp.f32 %v584_v61  ;;  %v591_v1 = vadd.f32 1.0, %v2274_v62 }
 0x246   : > { %2277 = vrcp.f32 %v591_v1  ;;  %v3589_v1 = vld [vmem:[#allocation13_spill] sm:$0xff] }
 0x251   : > { %v2276_v44 = vpop.eup %2275 }
 0x252   : > { %v595_v45 = vmul.f32 %v2276_v44, %v594_v50  ;;  %v3592_v44 = vld [vmem:[#allocation12_spill] sm:$0xff]  ;;  %v1736_v50 = vld [vmem:[%s2671_s4 + $0x30] sm:$0xff] }
 0x253   : > { %v2278_v52 = vpop.eup %2277 }
 0x254   : > { %v596_v63 = vadd.f32 %v1732_v42, %v595_v45  ;;  %v598_v53 = vsub.f32 1.0, %v2278_v52  ;;  %v600_v56 = vmul.f32 %v2278_v52, %v2932_v5  ;;  %v3590_v5 = vld [vmem:[#allocation14_spill] sm:$0xff]  ;;  %v3591_v42 = vld [vmem:[#allocation15_spill] sm:$0xff] }
 0x255   : > { %v1737_v45 = vld [vmem:[%s2671_s4 + $0x38] sm:$0xff] }
 0x256   : > { %2279 = vtanh.f32 %v596_v63 }
 0x263   : > { %v2280_v54 = vpop.eup %2279 }
 0x264   : > { %v599_v55 = vmul.f32 %v2280_v54, %v598_v53 }
 0x266   : > { %v3010_v57 = vadd.f32 %v600_v56, %v599_v55 }
 0x268   : > { %1735 = vst [vmem:[%s2682_s28 + $0x8] sm:$0xff] %v3010_v57  ;;  %673 = vmatmul.mubr.f32.vlgmr.msra.gmra.mxu0 %v3010_v57  ;;  %2017 = vmatmul.mubr.f32.vlgmr.msra.gmra.mxu1 %v3010_v57 }
 0x269   : > { %778 = vmatpush1.msra.mxu0 %v2688_v2  ;;  %2020 = vmatpush3.msra.mxu1 %v2726_v15 }
 0x26a   : > { %779 = vmatprep.subr.mxu0 %v2690_v3  ;;  %2021 = vmatprep.subr.mxu1 %v3588_v58 }
 0x26b   : > { %780 = vmatpush1.msra.mxu0 %v2693_v4  ;;  %2022 = vmatpush3.msra.mxu1 %v2732_v17 }
 0x26c   : > { %781 = vmatprep.subr.mxu0 %v2697_v6  ;;  %2023 = vmatprep.subr.mxu1 %v3588_v58 }
 0x26d   : > { %782 = vmatpush1.msra.mxu0 %v2701_v7  ;;  %2024 = vmatpush3.msra.mxu1 %v2738_v19 }
 0x26e   : > { %783 = vmatprep.subr.mxu0 %v2706_v8  ;;  %2025 = vmatprep.subr.mxu1 %v3588_v58 }
 0x26f   : > { %784 = vmatpush1.msra.mxu0 %v2709_v9  ;;  %2026 = vmatpush3.msra.mxu1 %v2748_v22 }
 0x270   : > { %785 = vmatprep.subr.mxu0 %v2712_v10  ;;  %2027 = vmatprep.subr.mxu1 %v3588_v58 }
 0x271   : > { %786 = vmatpush1.msra.mxu0 %v2715_v11  ;;  %2028 = vmatpush3.msra.mxu1 %v2758_v25 }
 0x272   : > { %787 = vmatprep.subr.mxu0 %v2718_v12  ;;  %2029 = vmatprep.subr.mxu1 %v3588_v58 }
 0x273   : > { %788 = vmatpush1.msra.mxu0 %v2721_v13  ;;  %2030 = vmatpush3.msra.mxu1 %v2768_v28 }
 0x274   : > { %789 = vmatprep.subr.mxu0 %v2724_v14  ;;  %2031 = vmatprep.subr.mxu1 %v3588_v58 }
 0x275   : > { %790 = vmatpush1.msra.mxu0 %v2729_v16  ;;  %2032 = vmatpush3.msra.mxu1 %v2778_v31 }
 0x276   : > { %791 = vmatprep.subr.mxu0 %v2735_v18  ;;  %2033 = vmatprep.subr.mxu1 %v3588_v58 }
 0x277   : > { %792 = vmatpush1.msra.mxu0 %v2741_v20  ;;  %2034 = vmatpush3.msra.mxu1 %v2788_v34 }
 0x278   : > { %793 = vmatprep.subr.mxu0 %v2745_v21  ;;  %2035 = vmatprep.subr.mxu1 %v3588_v58 }
 0x279   : > { %794 = vmatpush1.msra.mxu0 %v2751_v23  ;;  %2036 = vmatpush3.msra.mxu1 %v2798_v37 }
 0x27a   : > { %795 = vmatprep.subr.mxu0 %v2755_v24  ;;  %2037 = vmatprep.subr.mxu1 %v3588_v58 }
 0x27b   : > { %796 = vmatpush1.msra.mxu0 %v2761_v26  ;;  %2038 = vmatpush3.msra.mxu1 %v2808_v40 }
 0x27c   : > { %797 = vmatprep.subr.mxu0 %v2765_v27  ;;  %2039 = vmatprep.subr.mxu1 %v3588_v58 }
 0x27d   : > { %798 = vmatpush1.msra.mxu0 %v2771_v29  ;;  %2040 = vmatpush3.msra.mxu1 %v2818_v43 }
 0x27e   : > { %799 = vmatprep.subr.mxu0 %v2775_v30  ;;  %2041 = vmatprep.subr.mxu1 %v3588_v58 }
 0x27f   : > { %800 = vmatpush1.msra.mxu0 %v2781_v32  ;;  %2042 = vmatpush3.msra.mxu1 %v2828_v46 }
 0x280   : > { %801 = vmatprep.subr.mxu0 %v2785_v33  ;;  %2043 = vmatprep.subr.mxu1 %v3588_v58 }
 0x281   : > { %802 = vmatpush1.msra.mxu0 %v2791_v35  ;;  %2044 = vmatpush3.msra.mxu1 %v2834_v47 }
 0x282   : > { %803 = vmatprep.subr.mxu0 %v2795_v36  ;;  %2045 = vmatprep.subr.mxu1 %v3588_v58 }
 0x283   : > { %804 = vmatpush1.msra.mxu0 %v2801_v38  ;;  %2046 = vmatpush3.msra.mxu1 %v2839_v48 }
 0x284   : > { %805 = vmatprep.subr.mxu0 %v2805_v39  ;;  %2047 = vmatprep.subr.mxu1 %v3588_v58 }
 0x285   : > { %806 = vmatpush1.msra.mxu0 %v2811_v41  ;;  %2048 = vmatpush3.msra.mxu1 %v2845_v49 }
 0x286   : > { %807 = vmatprep.subr.mxu0 %v3589_v1  ;;  %2049 = vmatprep.subr.mxu1 %v3588_v58  ;;  %v1738_v1 = vld [vmem:[%s2671_s4 + $0x40] sm:$0xff] }
 0x287   : > { %808 = vmatpush1.msra.mxu0 %v3590_v5  ;;  %841 = vmatprep.mubr.f32.mxu0 %v3588_v58 }
 0x288   : > { %2050 = vmatpush3.msra.mxu1 %v3591_v42  ;;  %2051 = vmatprep.mubr.msk.f32.mxu1 %vm2520_vm0, %v3588_v58 }
 0x289   : > { %946 = vmatprep.subr.mxu0 %v3592_v44  ;;  %2054 = vmatprep.subr.mxu1 %v3588_v58 }
 0x328   : > { %v674_v51 = vpop.f32.mrf.mxu0  ;;  %v745_v59 = vpop.f32.mrf.mxu1 }
 0x329   : > { %v749_v60 = vadd.f32 %v1736_v50, %v674_v51  ;;  %v763_v42 = vadd.f32 %v2927_v0, %v745_v59 }
 0x32a   : > { %v2018_v61 = vpop.f32.mrf.mxu1  ;;  %v676_v63 = vpop.f32.mrf.mxu0 }
 0x32b   : > { %v1739_v62 = vmul.f32 -1.442695, %v749_v60  ;;  %v756_v52 = vadd.f32 %v1737_v45, %v676_v63 }
 0x32d   : > { %2281 = vpow2.f32 %v1739_v62  ;;  %v1740_v53 = vmul.f32 -1.442695, %v756_v52 }
 0x32f   : > { %2283 = vpow2.f32 %v1740_v53 }
 0x33a   : > { %v2282_v54 = vpop.eup %2281 }
 0x33b   : > { %v753_v55 = vadd.f32 1.0, %v2282_v54  ;;  %v1744_v54 = vld [vmem:[%s2671_s4 + $0x58] sm:$0xff] }
 0x33c   : > { %v2284_v56 = vpop.eup %2283 }
 0x33d   : > { %2285 = vrcp.f32 %v753_v55  ;;  %v760_v44 = vadd.f32 1.0, %v2284_v56 }
 0x33f   : > { %2287 = vrcp.f32 %v760_v44 }
 0x34a   : > { %v2286_v5 = vpop.eup %2285 }
 0x34b   : > { %v764_v50 = vmul.f32 %v2286_v5, %v763_v42 }
 0x34c   : > { %v2288_v60 = vpop.eup %2287 }
 0x34d   : > { %v765_v51 = vadd.f32 %v1738_v1, %v764_v50  ;;  %v767_v61 = vsub.f32 1.0, %v2288_v60  ;;  %v769_v63 = vmul.f32 %v2288_v60, %v3010_v57 }
 0x34f   : > { %2289 = vtanh.f32 %v765_v51 }
 0x35c   : > { %v2290_v62 = vpop.eup %2289 }
 0x35d   : > { %v768_v45 = vmul.f32 %v2290_v62, %v767_v61 }
 0x35f   : > { %v3088_v52 = vadd.f32 %v769_v63, %v768_v45  ;;  %v3172_v63 = vld [vmem:[#allocation6 + $0x168] sm:$0xff] }
 0x361   : > { %1741 = vst [vmem:[%s2682_s28 + $0x10] sm:$0xff] %v3088_v52  ;;  %842 = vmatmul.mubr.f32.vlgmr.msra.gmra.mxu0 %v3088_v52  ;;  %2052 = vmatmul.mubr.f32.vlgmr.msra.gmra.mxu1 %v3088_v52 }
 0x362   : > { %947 = vmatpush1.msra.mxu0 %v2688_v2  ;;  %2055 = vmatpush3.msra.mxu1 %v2726_v15  ;;  %v3593_v2 = vld [vmem:[#allocation13_spill] sm:$0xff] }
 0x363   : > { %948 = vmatprep.subr.mxu0 %v2690_v3  ;;  %2056 = vmatprep.subr.mxu1 %v3588_v58  ;;  %v3594_v3 = vld [vmem:[#allocation14_spill] sm:$0xff] }
 0x364   : > { %949 = vmatpush1.msra.mxu0 %v2693_v4  ;;  %2057 = vmatpush3.msra.mxu1 %v2732_v17  ;;  %v3595_v4 = vld [vmem:[#allocation15_spill] sm:$0xff] }
 0x365   : > { %950 = vmatprep.subr.mxu0 %v2697_v6  ;;  %2058 = vmatprep.subr.mxu1 %v3588_v58  ;;  %v3596_v6 = vld [vmem:[#allocation12_spill] sm:$0xff] }
 0x366   : > { %951 = vmatpush1.msra.mxu0 %v2701_v7  ;;  %2059 = vmatpush3.msra.mxu1 %v2738_v19  ;;  %v1742_v7 = vld [vmem:[%s2671_s4 + $0x48] sm:$0xff] }
 0x367   : > { %952 = vmatprep.subr.mxu0 %v2706_v8  ;;  %2060 = vmatprep.subr.mxu1 %v3588_v58 }
 0x368   : > { %953 = vmatpush1.msra.mxu0 %v2709_v9  ;;  %2061 = vmatpush3.msra.mxu1 %v2748_v22 }
 0x369   : > { %954 = vmatprep.subr.mxu0 %v2712_v10  ;;  %2062 = vmatprep.subr.mxu1 %v3588_v58 }
 0x36a   : > { %955 = vmatpush1.msra.mxu0 %v2715_v11  ;;  %2063 = vmatpush3.msra.mxu1 %v2758_v25 }
 0x36b   : > { %956 = vmatprep.subr.mxu0 %v2718_v12  ;;  %2064 = vmatprep.subr.mxu1 %v3588_v58 }
 0x36c   : > { %957 = vmatpush1.msra.mxu0 %v2721_v13  ;;  %2065 = vmatpush3.msra.mxu1 %v2768_v28  ;;  %v1743_v13 = vld [vmem:[%s2671_s4 + $0x50] sm:$0xff] }
 0x36d   : > { %958 = vmatprep.subr.mxu0 %v2724_v14  ;;  %2066 = vmatprep.subr.mxu1 %v3588_v58 }
 0x36e   : > { %959 = vmatpush1.msra.mxu0 %v2729_v16  ;;  %2067 = vmatpush3.msra.mxu1 %v2778_v31 }
 0x36f   : > { %960 = vmatprep.subr.mxu0 %v2735_v18  ;;  %2068 = vmatprep.subr.mxu1 %v3588_v58 }
 0x370   : > { %961 = vmatpush1.msra.mxu0 %v2741_v20  ;;  %2069 = vmatpush3.msra.mxu1 %v2788_v34 }
 0x371   : > { %962 = vmatprep.subr.mxu0 %v2745_v21  ;;  %2070 = vmatprep.subr.mxu1 %v3588_v58 }
 0x372   : > { %963 = vmatpush1.msra.mxu0 %v2751_v23  ;;  %2071 = vmatpush3.msra.mxu1 %v2798_v37 }
 0x373   : > { %964 = vmatprep.subr.mxu0 %v2755_v24  ;;  %2072 = vmatprep.subr.mxu1 %v3588_v58 }
 0x374   : > { %965 = vmatpush1.msra.mxu0 %v2761_v26  ;;  %2073 = vmatpush3.msra.mxu1 %v2808_v40 }
 0x375   : > { %966 = vmatprep.subr.mxu0 %v2765_v27  ;;  %2074 = vmatprep.subr.mxu1 %v3588_v58 }
 0x376   : > { %967 = vmatpush1.msra.mxu0 %v2771_v29  ;;  %2075 = vmatpush3.msra.mxu1 %v2818_v43 }
 0x377   : > { %968 = vmatprep.subr.mxu0 %v2775_v30  ;;  %2076 = vmatprep.subr.mxu1 %v3588_v58 }
 0x378   : > { %969 = vmatpush1.msra.mxu0 %v2781_v32  ;;  %2077 = vmatpush3.msra.mxu1 %v2828_v46 }
 0x379   : > { %970 = vmatprep.subr.mxu0 %v2785_v33  ;;  %2078 = vmatprep.subr.mxu1 %v3588_v58 }
 0x37a   : > { %971 = vmatpush1.msra.mxu0 %v2791_v35  ;;  %2079 = vmatpush3.msra.mxu1 %v2834_v47 }
 0x37b   : > { %972 = vmatprep.subr.mxu0 %v2795_v36  ;;  %2080 = vmatprep.subr.mxu1 %v3588_v58 }
 0x37c   : > { %973 = vmatpush1.msra.mxu0 %v2801_v38  ;;  %2081 = vmatpush3.msra.mxu1 %v2839_v48 }
 0x37d   : > { %974 = vmatprep.subr.mxu0 %v2805_v39  ;;  %2082 = vmatprep.subr.mxu1 %v3588_v58 }
 0x37e   : > { %975 = vmatpush1.msra.mxu0 %v2811_v41  ;;  %2083 = vmatpush3.msra.mxu1 %v2845_v49 }
 0x37f   : > { %976 = vmatprep.subr.mxu0 %v3593_v2  ;;  %2084 = vmatprep.subr.mxu1 %v3588_v58 }
 0x380   : > { %977 = vmatpush1.msra.mxu0 %v3594_v3  ;;  %1010 = vmatprep.mubr.f32.mxu0 %v3588_v58 }
 0x381   : > { %2085 = vmatpush3.msra.mxu1 %v3595_v4  ;;  %2086 = vmatprep.mubr.msk.f32.mxu1 %vm2520_vm0, %v3588_v58 }
 0x382   : > { %1115 = vmatprep.subr.mxu0 %v3596_v6  ;;  %2089 = vmatprep.subr.mxu1 %v3588_v58  ;;  %v3176_v6 = vld [vmem:[#allocation6 + $0x158] sm:$0xff] }
 0x421   : > { %v843_v8 = vpop.f32.mrf.mxu0  ;;  %v914_v9 = vpop.f32.mrf.mxu1 }
 0x422   : > { %v918_v10 = vadd.f32 %v1742_v7, %v843_v8  ;;  %v932_v59 = vadd.f32 %v2927_v0, %v914_v9  ;;  %v3184_v7 = vld [vmem:[#allocation6 + $0x140] sm:$0xff]  ;;  %v3188_v8 = vld [vmem:[#allocation6 + $0x138] sm:$0xff] }
 0x423   : > { %v2053_v11 = vpop.f32.mrf.mxu1  ;;  %v845_v14 = vpop.f32.mrf.mxu0  ;;  %v3196_v9 = vld [vmem:[#allocation6 + $0x120] sm:$0xff] }
 0x424   : > { %v1745_v12 = vmul.f32 -1.442695, %v918_v10  ;;  %v925_v16 = vadd.f32 %v1743_v13, %v845_v14  ;;  %v3204_v10 = vld [vmem:[#allocation6 + $0x108] sm:$0xff]  ;;  %v3212_v11 = vld [vmem:[#allocation6 + $0xf0] sm:$0xff]  ;;  %v3303_v13 = vld [vmem:[#allocation6 + $0x118] sm:$0xff] }
 0x425   : > { %v3309_v14 = vld [vmem:[#allocation6 + $0x100] sm:$0xff] }
 0x426   : > { %2291 = vpow2.f32 %v1745_v12  ;;  %v1746_v57 = vmul.f32 -1.442695, %v925_v16  ;;  %v3220_v12 = vld [vmem:[#allocation6 + $0xd8] sm:$0xff]  ;;  %v3315_v16 = vld [vmem:[#allocation6 + $0xe8] sm:$0xff] }
 0x428   : > { %2293 = vpow2.f32 %v1746_v57  ;;  %v3318_v57 = vld [vmem:[#allocation6 + $0xc8] sm:$0xff] }
 0x433   : > { %v2292_v1 = vpop.eup %2291 }
 0x434   : > { %v922_v5 = vadd.f32 1.0, %v2292_v1  ;;  %v3322_v1 = vld [vmem:[#allocation6 + $0xc0] sm:$0xff] }
 0x435   : > { %v2294_v42 = vpop.eup %2293 }
 0x436   : > { %2295 = vrcp.f32 %v922_v5  ;;  %v929_v44 = vadd.f32 1.0, %v2294_v42  ;;  %v3325_v5 = vld [vmem:[#allocation6 + $0xd0] sm:$0xff] }
 0x437   : > { %v3328_v42 = vld [vmem:[#allocation6 + $0xb0] sm:$0xff] }
 0x438   : > { %2297 = vrcp.f32 %v929_v44  ;;  %v3332_v44 = vld [vmem:[#allocation6 + $0xa8] sm:$0xff] }
 0x443   : > { %v2296_v53 = vpop.eup %2295 }
 0x444   : > { %v933_v55 = vmul.f32 %v2296_v53, %v932_v59  ;;  %v3335_v59 = vld [vmem:[#allocation6 + $0xb8] sm:$0xff] }
 0x445   : > { %v2298_v50 = vpop.eup %2297  ;;  %v3338_v53 = vld [vmem:[#allocation6 + $0x98] sm:$0xff] }
 0x446   : > { %v934_v56 = vadd.f32 %v1744_v54, %v933_v55  ;;  %v936_v51 = vsub.f32 1.0, %v2298_v50  ;;  %v938_v62 = vmul.f32 %v2298_v50, %v3088_v52  ;;  %v3180_v52 = vld [vmem:[#allocation6 + $0x150] sm:$0xff]  ;;  %v3345_v55 = vld [vmem:[#allocation6 + $0xa0] sm:$0xff]  ;;  %v3352_v50 = vld [vmem:[#allocation6 + $0x78] sm:$0xff] }
 0x447   : > { %v3342_v54 = vld [vmem:[#allocation6 + $0x90] sm:$0xff] }
 0x448   : > { %2299 = vtanh.f32 %v934_v56  ;;  %v3348_v56 = vld [vmem:[#allocation6 + $0x80] sm:$0xff] }
 0x455   : > { %v2300_v60 = vpop.eup %2299 }
 0x456   : > { %v937_v61 = vmul.f32 %v2300_v60, %v936_v51  ;;  %v3355_v51 = vld [vmem:[#allocation6 + $0x88] sm:$0xff] }
 0x457   : > { %v3358_v60 = vld [vmem:[#allocation6 + $0x68] sm:$0xff] }
 0x458   : > { %v3166_v45 = vadd.f32 %v938_v62, %v937_v61  ;;  %v3362_v61 = vld [vmem:[#allocation6 + $0x60] sm:$0xff]  ;;  %v3365_v62 = vld [vmem:[#allocation6 + $0x70] sm:$0xff] }
 0x45a   : > { %1747 = vst [vmem:[%s2682_s28 + $0x18] sm:$0xff] %v3166_v45  ;;  %1011 = vmatmul.mubr.f32.vlgmr.msra.gmra.mxu0 %v3166_v45  ;;  %2087 = vmatmul.mubr.f32.vlgmr.msra.gmra.mxu1 %v3166_v45 }
 0x45b   : > { %1116 = vmatpush1.msra.mxu0 %v3172_v63  ;;  %2090 = vmatpush3.msra.mxu1 %v2726_v15  ;;  %v3192_v15 = vld [vmem:[#allocation6 + $0x128] sm:$0xff] }
 0x45c   : > { %1117 = vmatprep.subr.mxu0 %v3176_v6  ;;  %2091 = vmatprep.subr.mxu1 %v3588_v58 }
 0x45d   : > { %1118 = vmatpush1.msra.mxu0 %v3180_v52  ;;  %2092 = vmatpush3.msra.mxu1 %v2732_v17  ;;  %v3200_v17 = vld [vmem:[#allocation6 + $0x110] sm:$0xff] }
 0x45e   : > { %1119 = vmatprep.subr.mxu0 %v3184_v7  ;;  %2093 = vmatprep.subr.mxu1 %v3588_v58 }
 0x45f   : > { %1120 = vmatpush1.msra.mxu0 %v3188_v8  ;;  %2094 = vmatpush3.msra.mxu1 %v2738_v19  ;;  %v3208_v19 = vld [vmem:[#allocation6 + $0xf8] sm:$0xff] }
 0x460   : > { %1121 = vmatprep.subr.mxu0 %v3192_v15  ;;  %2095 = vmatprep.subr.mxu1 %v3588_v58 }
 0x461   : > { %1122 = vmatpush1.msra.mxu0 %v3196_v9  ;;  %2096 = vmatpush3.msra.mxu1 %v2748_v22  ;;  %v3216_v22 = vld [vmem:[#allocation6 + $0xe0] sm:$0xff] }
 0x462   : > { %1123 = vmatprep.subr.mxu0 %v3200_v17  ;;  %2097 = vmatprep.subr.mxu1 %v3588_v58 }
 0x463   : > { %1124 = vmatpush1.msra.mxu0 %v3204_v10  ;;  %2098 = vmatpush3.msra.mxu1 %v2758_v25 }
 0x464   : > { %1125 = vmatprep.subr.mxu0 %v3208_v19  ;;  %2099 = vmatprep.subr.mxu1 %v3588_v58 }
 0x465   : > { %1126 = vmatpush1.msra.mxu0 %v3212_v11  ;;  %2100 = vmatpush3.msra.mxu1 %v2768_v28 }
 0x466   : > { %1127 = vmatprep.subr.mxu0 %v3216_v22  ;;  %2101 = vmatprep.subr.mxu1 %v3588_v58 }
 0x467   : > { %1128 = vmatpush1.msra.mxu0 %v3220_v12  ;;  %2102 = vmatpush3.msra.mxu1 %v2778_v31 }
 0x468   : > { %1129 = vmatprep.subr.mxu0 %v2735_v18  ;;  %2103 = vmatprep.subr.mxu1 %v3588_v58  ;;  %v3263_v18 = vld [vmem:[#allocation6 + $0x170] sm:$0xff] }
 0x469   : > { %1130 = vmatpush1.msra.mxu0 %v2741_v20  ;;  %2104 = vmatpush3.msra.mxu1 %v2788_v34  ;;  %v1748_v20 = vld [vmem:[%s2671_s4 + $0x60] sm:$0xff] }
 0x46a   : > { %1131 = vmatprep.subr.mxu0 %v2745_v21  ;;  %2105 = vmatprep.subr.mxu1 %v3588_v58 }
 0x46b   : > { %1132 = vmatpush1.msra.mxu0 %v2751_v23  ;;  %2106 = vmatpush3.msra.mxu1 %v2798_v37  ;;  %v1750_v37 = vld [vmem:[%s2671_s4 + $0x70] sm:$0xff] }
 0x46c   : > { %1133 = vmatprep.subr.mxu0 %v2755_v24  ;;  %2107 = vmatprep.subr.mxu1 %v3588_v58 }
 0x46d   : > { %1134 = vmatpush1.msra.mxu0 %v2761_v26  ;;  %2108 = vmatpush3.msra.mxu1 %v2808_v40 }
 0x46e   : > { %1135 = vmatprep.subr.mxu0 %v2765_v27  ;;  %2109 = vmatprep.subr.mxu1 %v3588_v58  ;;  %v1749_v27 = vld [vmem:[%s2671_s4 + $0x68] sm:$0xff] }
 0x46f   : > { %1136 = vmatpush1.msra.mxu0 %v2771_v29  ;;  %2110 = vmatpush3.msra.mxu1 %v2818_v43 }
 0x470   : > { %1137 = vmatprep.subr.mxu0 %v2775_v30  ;;  %2111 = vmatprep.subr.mxu1 %v3588_v58 }
 0x471   : > { %1138 = vmatpush1.msra.mxu0 %v2781_v32  ;;  %2112 = vmatpush3.msra.mxu1 %v2828_v46 }
 0x472   : > { %1139 = vmatprep.subr.mxu0 %v2785_v33  ;;  %2113 = vmatprep.subr.mxu1 %v3588_v58 }
 0x473   : > { %1140 = vmatpush1.msra.mxu0 %v2791_v35  ;;  %2114 = vmatpush3.msra.mxu1 %v2834_v47 }
 0x474   : > { %1141 = vmatprep.subr.mxu0 %v2795_v36  ;;  %2115 = vmatprep.subr.mxu1 %v3588_v58 }
 0x475   : > { %1142 = vmatpush1.msra.mxu0 %v2801_v38  ;;  %2116 = vmatpush3.msra.mxu1 %v2839_v48 }
 0x476   : > { %1143 = vmatprep.subr.mxu0 %v2805_v39  ;;  %2117 = vmatprep.subr.mxu1 %v3588_v58 }
 0x477   : > { %1144 = vmatpush1.msra.mxu0 %v2811_v41  ;;  %2118 = vmatpush3.msra.mxu1 %v2845_v49  ;;  %v3279_v49 = vld [vmem:[#allocation6 + $0x178] sm:$0xff] }
 0x478   : > { %1145 = vmatprep.subr.mxu0 %v3593_v2  ;;  %2119 = vmatprep.subr.mxu1 %v3588_v58  ;;  %v3285_v2 = vld [vmem:[#allocation6 + $0x160] sm:$0xff] }
 0x479   : > { %1146 = vmatpush1.msra.mxu0 %v3594_v3  ;;  %1179 = vmatprep.mubr.f32.mxu0 %v3588_v58  ;;  %v3291_v3 = vld [vmem:[#allocation6 + $0x148] sm:$0xff] }
 0x47a   : > { %2120 = vmatpush3.msra.mxu1 %v3595_v4  ;;  %2121 = vmatprep.mubr.msk.f32.mxu1 %vm2520_vm0, %v3588_v58  ;;  %v3297_v4 = vld [vmem:[#allocation6 + $0x130] sm:$0xff] }
 0x47b   : > { %1284 = vmatprep.subr.mxu0 %v3263_v18  ;;  %2124 = vmatprep.subr.mxu1 %v3588_v58 }
 0x51a   : > { %v1012_v21 = vpop.f32.mrf.mxu0  ;;  %v1083_v23 = vpop.f32.mrf.mxu1 }
 0x51b   : > { %v1087_v24 = vadd.f32 %v1748_v20, %v1012_v21  ;;  %v1101_v35 = vadd.f32 %v2927_v0, %v1083_v23  ;;  %v3372_v20 = vld [vmem:[#allocation6 + $0x48] sm:$0xff]  ;;  %v3375_v21 = vld [vmem:[#allocation6 + $0x58] sm:$0xff] }
 0x51c   : > { %v2088_v25 = vpop.f32.mrf.mxu1  ;;  %v1014_v28 = vpop.f32.mrf.mxu0  ;;  %v3378_v23 = vld [vmem:[#allocation6 + $0x38] sm:$0xff] }
 0x51d   : > { %v1751_v26 = vmul.f32 -1.442695, %v1087_v24  ;;  %v1094_v29 = vadd.f32 %v1749_v27, %v1014_v28  ;;  %v3382_v24 = vld [vmem:[#allocation6 + $0x30] sm:$0xff]  ;;  %v3385_v25 = vld [vmem:[#allocation6 + $0x40] sm:$0xff]  ;;  %v3392_v27 = vld [vmem:[#allocation6 + $0x18] sm:$0xff] }
 0x51e   : > { %v3395_v28 = vld [vmem:[#allocation6 + $0x28] sm:$0xff] }
 0x51f   : > { %2301 = vpow2.f32 %v1751_v26  ;;  %v1752_v30 = vmul.f32 -1.442695, %v1094_v29  ;;  %v3388_v26 = vld [vmem:[#allocation6 + $0x20] sm:$0xff]  ;;  %v3398_v29 = vld [vmem:[#allocation6 + $0x8] sm:$0xff] }
 0x520   : > { %3597 = vst [vmem:[#allocation13_spill] sm:$0xff] %v3398_v29 }
 0x521   : > { %2303 = vpow2.f32 %v1752_v30  ;;  %v3402_v30 = vld [vmem:[#allocation6] sm:$0xff] }
 0x522   : > { %3598 = vst [vmem:[#allocation14_spill] sm:$0xff] %v3402_v30 }
 0x52c   : > { %v2302_v31 = vpop.eup %2301 }
 0x52d   : > { %v1091_v32 = vadd.f32 1.0, %v2302_v31  ;;  %v3406_v31 = vld [vmem:[#allocation6 + $0x10] sm:$0xff] }
 0x52e   : > { %v2304_v33 = vpop.eup %2303  ;;  %3599 = vst [vmem:[#allocation15_spill] sm:$0xff] %v3406_v31 }
 0x52f   : > { %2305 = vrcp.f32 %v1091_v32  ;;  %v1098_v34 = vadd.f32 1.0, %v2304_v33  ;;  %v1754_v32 = vld [vmem:[%s2671_s4 + $0x78] sm:$0xff] }
 0x531   : > { %2307 = vrcp.f32 %v1098_v34 }
 0x53c   : > { %v2306_v36 = vpop.eup %2305 }
 0x53d   : > { %v1102_v38 = vmul.f32 %v2306_v36, %v1101_v35 }
 0x53e   : > { %v2308_v40 = vpop.eup %2307 }
 0x53f   : > { %v1103_v39 = vadd.f32 %v1750_v37, %v1102_v38  ;;  %v1105_v41 = vsub.f32 1.0, %v2308_v40  ;;  %v1107_v47 = vmul.f32 %v2308_v40, %v3166_v45  ;;  %v3368_v45 = vld [vmem:[#allocation6 + $0x50] sm:$0xff]  ;;  %v1755_v38 = vld [vmem:[%s2671_s4 + $0x80] sm:$0xff] }
 0x541   : > { %2309 = vtanh.f32 %v1103_v39 }
 0x54e   : > { %v2310_v43 = vpop.eup %2309 }
 0x54f   : > { %v1106_v46 = vmul.f32 %v2310_v43, %v1105_v41 }
 0x551   : > { %v3272_v48 = vadd.f32 %v1107_v47, %v1106_v46 }
 0x553   : > { %1753 = vst [vmem:[%s2682_s28 + $0x20] sm:$0xff] %v3272_v48  ;;  %1180 = vmatmul.mubr.f32.vlgmr.msra.gmra.mxu0 %v3272_v48  ;;  %2122 = vmatmul.mubr.f32.vlgmr.msra.gmra.mxu1 %v3272_v48 }
 0x554   : > { %1285 = vmatpush1.msra.mxu0 %v3172_v63  ;;  %2125 = vmatpush3.msra.mxu1 %v3279_v49 }
 0x555   : > { %1286 = vmatprep.subr.mxu0 %v3176_v6  ;;  %2126 = vmatprep.subr.mxu1 %v3588_v58 }
 0x556   : > { %1287 = vmatpush1.msra.mxu0 %v3180_v52  ;;  %2127 = vmatpush3.msra.mxu1 %v3285_v2 }
 0x557   : > { %1288 = vmatprep.subr.mxu0 %v3184_v7  ;;  %2128 = vmatprep.subr.mxu1 %v3588_v58 }
 0x558   : > { %1289 = vmatpush1.msra.mxu0 %v3188_v8  ;;  %2129 = vmatpush3.msra.mxu1 %v3291_v3 }
 0x559   : > { %1290 = vmatprep.subr.mxu0 %v3192_v15  ;;  %2130 = vmatprep.subr.mxu1 %v3588_v58 }
 0x55a   : > { %1291 = vmatpush1.msra.mxu0 %v3196_v9  ;;  %2131 = vmatpush3.msra.mxu1 %v3297_v4 }
 0x55b   : > { %1292 = vmatprep.subr.mxu0 %v3200_v17  ;;  %2132 = vmatprep.subr.mxu1 %v3588_v58 }
 0x55c   : > { %1293 = vmatpush1.msra.mxu0 %v3204_v10  ;;  %2133 = vmatpush3.msra.mxu1 %v3303_v13 }
 0x55d   : > { %1294 = vmatprep.subr.mxu0 %v3208_v19  ;;  %2134 = vmatprep.subr.mxu1 %v3588_v58 }
 0x55e   : > { %1295 = vmatpush1.msra.mxu0 %v3212_v11  ;;  %2135 = vmatpush3.msra.mxu1 %v3309_v14 }
 0x55f   : > { %1296 = vmatprep.subr.mxu0 %v3216_v22  ;;  %2136 = vmatprep.subr.mxu1 %v3588_v58 }
 0x560   : > { %1297 = vmatpush1.msra.mxu0 %v3220_v12  ;;  %2137 = vmatpush3.msra.mxu1 %v3315_v16 }
 0x561   : > { %1298 = vmatprep.subr.mxu0 %v3318_v57  ;;  %2138 = vmatprep.subr.mxu1 %v3588_v58 }
 0x562   : > { %1299 = vmatpush1.msra.mxu0 %v3322_v1  ;;  %2139 = vmatpush3.msra.mxu1 %v3325_v5 }
 0x563   : > { %1300 = vmatprep.subr.mxu0 %v3328_v42  ;;  %2140 = vmatprep.subr.mxu1 %v3588_v58 }
 0x564   : > { %1301 = vmatpush1.msra.mxu0 %v3332_v44  ;;  %2141 = vmatpush3.msra.mxu1 %v3335_v59 }
 0x565   : > { %1302 = vmatprep.subr.mxu0 %v3338_v53  ;;  %2142 = vmatprep.subr.mxu1 %v3588_v58 }
 0x566   : > { %1303 = vmatpush1.msra.mxu0 %v3342_v54  ;;  %2143 = vmatpush3.msra.mxu1 %v3345_v55 }
 0x567   : > { %1304 = vmatprep.subr.mxu0 %v3348_v56  ;;  %2144 = vmatprep.subr.mxu1 %v3588_v58 }
 0x568   : > { %1305 = vmatpush1.msra.mxu0 %v3352_v50  ;;  %2145 = vmatpush3.msra.mxu1 %v3355_v51 }
 0x569   : > { %1306 = vmatprep.subr.mxu0 %v3358_v60  ;;  %2146 = vmatprep.subr.mxu1 %v3588_v58 }
 0x56a   : > { %1307 = vmatpush1.msra.mxu0 %v3362_v61  ;;  %2147 = vmatpush3.msra.mxu1 %v3365_v62 }
 0x56b   : > { %1308 = vmatprep.subr.mxu0 %v3368_v45  ;;  %2148 = vmatprep.subr.mxu1 %v3588_v58 }
 0x56c   : > { %1309 = vmatpush1.msra.mxu0 %v3372_v20  ;;  %2149 = vmatpush3.msra.mxu1 %v3375_v21 }
 0x56d   : > { %1310 = vmatprep.subr.mxu0 %v3378_v23  ;;  %2150 = vmatprep.subr.mxu1 %v3588_v58 }
 0x56e   : > { %1311 = vmatpush1.msra.mxu0 %v3382_v24  ;;  %2151 = vmatpush3.msra.mxu1 %v3385_v25 }
 0x56f   : > { %1312 = vmatprep.subr.mxu0 %v3388_v26  ;;  %2152 = vmatprep.subr.mxu1 %v3588_v58 }
 0x570   : > { %1313 = vmatpush1.msra.mxu0 %v3392_v27  ;;  %2153 = vmatpush3.msra.mxu1 %v3395_v28 }
 0x571   : > { %1314 = vmatprep.subr.mxu0 %v3398_v29  ;;  %2154 = vmatprep.subr.mxu1 %v3588_v58  ;;  %v1756_v29 = vld [vmem:[%s2671_s4 + $0x88] sm:$0xff] }
 0x572   : > { %1315 = vmatpush1.msra.mxu0 %v3402_v30  ;;  %1348 = vmatprep.mubr.f32.mxu0 %v3588_v58 }
 0x573   : > { %2155 = vmatpush3.msra.mxu1 %v3406_v31  ;;  %2156 = vmatprep.mubr.msk.f32.mxu1 %vm2520_vm0, %v3588_v58 }
 0x574   : > { %1453 = vmatprep.subr.mxu0 %v3263_v18  ;;  %2159 = vmatprep.subr.mxu1 %v3588_v58 }
 0x613   : > { %v1181_v33 = vpop.f32.mrf.mxu0  ;;  %v1252_v34 = vpop.f32.mrf.mxu1 }
 0x614   : > { %v1256_v35 = vadd.f32 %v1754_v32, %v1181_v33  ;;  %v1270_v31 = vadd.f32 %v2927_v0, %v1252_v34  ;;  %v3600_v0 = vld [vmem:[#allocation13_spill] sm:$0xff] }
 0x615   : > { %v2123_v36 = vpop.f32.mrf.mxu1  ;;  %v1183_v39 = vpop.f32.mrf.mxu0 }
 0x616   : > { %v1757_v37 = vmul.f32 -1.442695, %v1256_v35  ;;  %v1263_v40 = vadd.f32 %v1755_v38, %v1183_v39 }
 0x618   : > { %2311 = vpow2.f32 %v1757_v37  ;;  %v1758_v41 = vmul.f32 -1.442695, %v1263_v40 }
 0x61a   : > { %2313 = vpow2.f32 %v1758_v41 }
 0x625   : > { %v2312_v43 = vpop.eup %2311 }
 0x626   : > { %v1260_v46 = vadd.f32 1.0, %v2312_v43 }
 0x627   : > { %v2314_v18 = vpop.eup %2313 }
 0x628   : > { %2315 = vrcp.f32 %v1260_v46  ;;  %v1267_v47 = vadd.f32 1.0, %v2314_v18 }
 0x62a   : > { %2317 = vrcp.f32 %v1267_v47 }
 0x635   : > { %v2316_v30 = vpop.eup %2315 }
 0x636   : > { %v1271_v32 = vmul.f32 %v2316_v30, %v1270_v31 }
 0x637   : > { %v2318_v35 = vpop.eup %2317 }
 0x638   : > { %v1272_v33 = vadd.f32 %v1756_v29, %v1271_v32  ;;  %v1274_v36 = vsub.f32 1.0, %v2318_v35  ;;  %v1276_v39 = vmul.f32 %v2318_v35, %v3272_v48 }
 0x63a   : > { %2319 = vtanh.f32 %v1272_v33 }
 0x647   : > { %v2320_v37 = vpop.eup %2319 }
 0x648   : > { %v1275_v38 = vmul.f32 %v2320_v37, %v1274_v36 }
 0x64a   : > { %v3418_v40 = vadd.f32 %v1276_v39, %v1275_v38 }
 0x64c   : > { %1759 = vst [vmem:[%s2682_s28 + $0x28] sm:$0xff] %v3418_v40  ;;  %1349 = vmatmul.mubr.f32.vlgmr.msra.gmra.mxu0 %v3418_v40  ;;  %2157 = vmatmul.mubr.f32.vlgmr.msra.gmra.mxu1 %v3418_v40 }
 0x64d   : > { %1454 = vmatpush1.msra.mxu0 %v3172_v63  ;;  %2160 = vmatpush3.msra.mxu1 %v3279_v49  ;;  %v3601_v63 = vld [vmem:[#allocation14_spill] sm:$0xff] }
 0x64e   : > { %1455 = vmatprep.subr.mxu0 %v3176_v6  ;;  %2161 = vmatprep.subr.mxu1 %v3588_v58  ;;  %v3602_v6 = vld [vmem:[#allocation15_spill] sm:$0xff] }
 0x64f   : > { %1456 = vmatpush1.msra.mxu0 %v3180_v52  ;;  %2162 = vmatpush3.msra.mxu1 %v3285_v2  ;;  %v1760_v52 = vld [vmem:[%s2671_s4 + $0x90] sm:$0xff] }
 0x650   : > { %1457 = vmatprep.subr.mxu0 %v3184_v7  ;;  %2163 = vmatprep.subr.mxu1 %v3588_v58 }
 0x651   : > { %1458 = vmatpush1.msra.mxu0 %v3188_v8  ;;  %2164 = vmatpush3.msra.mxu1 %v3291_v3 }
 0x652   : > { %1459 = vmatprep.subr.mxu0 %v3192_v15  ;;  %2165 = vmatprep.subr.mxu1 %v3588_v58 }
 0x653   : > { %1460 = vmatpush1.msra.mxu0 %v3196_v9  ;;  %2166 = vmatpush3.msra.mxu1 %v3297_v4 }
 0x654   : > { %1461 = vmatprep.subr.mxu0 %v3200_v17  ;;  %2167 = vmatprep.subr.mxu1 %v3588_v58 }
 0x655   : > { %1462 = vmatpush1.msra.mxu0 %v3204_v10  ;;  %2168 = vmatpush3.msra.mxu1 %v3303_v13  ;;  %v1761_v10 = vld [vmem:[%s2671_s4 + $0x98] sm:$0xff]  ;;  %v1762_v13 = vld [vmem:[%s2671_s4 + $0xa0] sm:$0xff] }
 0x656   : > { %1463 = vmatprep.subr.mxu0 %v3208_v19  ;;  %2169 = vmatprep.subr.mxu1 %v3588_v58 }
 0x657   : > { %1464 = vmatpush1.msra.mxu0 %v3212_v11  ;;  %2170 = vmatpush3.msra.mxu1 %v3309_v14 }
 0x658   : > { %1465 = vmatprep.subr.mxu0 %v3216_v22  ;;  %2171 = vmatprep.subr.mxu1 %v3588_v58 }
 0x659   : > { %1466 = vmatpush1.msra.mxu0 %v3220_v12  ;;  %2172 = vmatpush3.msra.mxu1 %v3315_v16 }
 0x65a   : > { %1467 = vmatprep.subr.mxu0 %v3318_v57  ;;  %2173 = vmatprep.subr.mxu1 %v3588_v58 }
 0x65b   : > { %1468 = vmatpush1.msra.mxu0 %v3322_v1  ;;  %2174 = vmatpush3.msra.mxu1 %v3325_v5 }
 0x65c   : > { %1469 = vmatprep.subr.mxu0 %v3328_v42  ;;  %2175 = vmatprep.subr.mxu1 %v3588_v58 }
 0x65d   : > { %1470 = vmatpush1.msra.mxu0 %v3332_v44  ;;  %2176 = vmatpush3.msra.mxu1 %v3335_v59 }
 0x65e   : > { %1471 = vmatprep.subr.mxu0 %v3338_v53  ;;  %2177 = vmatprep.subr.mxu1 %v3588_v58  ;;  %v1766_v53 = vld [vmem:[%s2671_s4 + $0xa8] sm:$0xff] }
 0x65f   : > { %1472 = vmatpush1.msra.mxu0 %v3342_v54  ;;  %2178 = vmatpush3.msra.mxu1 %v3345_v55 }
 0x660   : > { %1473 = vmatprep.subr.mxu0 %v3348_v56  ;;  %2179 = vmatprep.subr.mxu1 %v3588_v58 }
 0x661   : > { %1474 = vmatpush1.msra.mxu0 %v3352_v50  ;;  %2180 = vmatpush3.msra.mxu1 %v3355_v51 }
 0x662   : > { %1475 = vmatprep.subr.mxu0 %v3358_v60  ;;  %2181 = vmatprep.subr.mxu1 %v3588_v58  ;;  %v1767_v60 = vld [vmem:[%s2671_s4 + $0xb0] sm:$0xff] }
 0x663   : > { %1476 = vmatpush1.msra.mxu0 %v3362_v61  ;;  %2182 = vmatpush3.msra.mxu1 %v3365_v62 }
 0x664   : > { %1477 = vmatprep.subr.mxu0 %v3368_v45  ;;  %2183 = vmatprep.subr.mxu1 %v3588_v58 }
 0x665   : > { %1478 = vmatpush1.msra.mxu0 %v3372_v20  ;;  %2184 = vmatpush3.msra.mxu1 %v3375_v21 }
 0x666   : > { %1479 = vmatprep.subr.mxu0 %v3378_v23  ;;  %2185 = vmatprep.subr.mxu1 %v3588_v58 }
 0x667   : > { %1480 = vmatpush1.msra.mxu0 %v3382_v24  ;;  %2186 = vmatpush3.msra.mxu1 %v3385_v25 }
 0x668   : > { %1481 = vmatprep.subr.mxu0 %v3388_v26  ;;  %2187 = vmatprep.subr.mxu1 %v3588_v58 }
 0x669   : > { %1482 = vmatpush1.msra.mxu0 %v3392_v27  ;;  %2188 = vmatpush3.msra.mxu1 %v3395_v28  ;;  %v1768_v27 = vld [vmem:[%s2671_s4 + $0xb8] sm:$0xff] }
 0x66a   : > { %1483 = vmatprep.subr.mxu0 %v3600_v0  ;;  %2189 = vmatprep.subr.mxu1 %v3588_v58 }
 0x66b   : > { %1484 = vmatpush1.msra.mxu0 %v3601_v63  ;;  %1517 = vmatprep.mubr.f32.mxu0 %v3588_v58 }
 0x66c   : > { %2190 = vmatpush3.msra.mxu1 %v3602_v6  ;;  %2191 = vmatprep.mubr.msk.f32.mxu1 %vm2520_vm0, %v3588_v58  ;;  %v2389_v58 = vld [vmem:[%s3553_s2] ss:$0 sm:$0xff] }
 0x70c   : > { %v1350_v7 = vpop.f32.mrf.mxu0  ;;  %v1421_v8 = vpop.f32.mrf.mxu1 }
 0x70d   : > { %v1425_v15 = vadd.f32 %v1760_v52, %v1350_v7  ;;  %v1439_v3 = vadd.f32 %v2389_v58, %v1421_v8 }
 0x70e   : > { %v2158_v9 = vpop.f32.mrf.mxu1  ;;  %v1352_v19 = vpop.f32.mrf.mxu0 }
 0x70f   : > { %v1763_v17 = vmul.f32 -1.442695, %v1425_v15  ;;  %v1432_v11 = vadd.f32 %v1761_v10, %v1352_v19 }
 0x711   : > { %2321 = vpow2.f32 %v1763_v17  ;;  %v1764_v22 = vmul.f32 -1.442695, %v1432_v11 }
 0x713   : > { %2323 = vpow2.f32 %v1764_v22 }
 0x71e   : > { %v2322_v12 = vpop.eup %2321 }
 0x71f   : > { %v1429_v48 = vadd.f32 1.0, %v2322_v12 }
 0x720   : > { %v2324_v49 = vpop.eup %2323 }
 0x721   : > { %2325 = vrcp.f32 %v1429_v48  ;;  %v1436_v2 = vadd.f32 1.0, %v2324_v49 }
 0x723   : > { %2327 = vrcp.f32 %v1436_v2 }
 0x72e   : > { %v2326_v4 = vpop.eup %2325 }
 0x72f   : > { %v1440_v14 = vmul.f32 %v2326_v4, %v1439_v3 }
 0x730   : > { %v2328_v57 = vpop.eup %2327 }
 0x731   : > { %v1441_v16 = vadd.f32 %v1762_v13, %v1440_v14  ;;  %v1443_v1 = vsub.f32 1.0, %v2328_v57  ;;  %v1445_v44 = vmul.f32 %v2328_v57, %v3418_v40 }
 0x733   : > { %2329 = vtanh.f32 %v1441_v16 }
 0x740   : > { %v2330_v5 = vpop.eup %2329 }
 0x741   : > { %v1444_v42 = vmul.f32 %v2330_v5, %v1443_v1 }
 0x743   : > { %v1446_v59 = vadd.f32 %v1445_v44, %v1444_v42 }
 0x745   : > { %1765 = vst [vmem:[%s2682_s28 + $0x30] sm:$0xff] %v1446_v59  ;;  %1518 = vmatmul.mubr.f32.vlgmr.msra.gmra.mxu0 %v1446_v59  ;;  %2192 = vmatmul.mubr.f32.vlgmr.msra.gmra.mxu1 %v1446_v59 }
 0x805   : > { %v1519_v54 = vpop.f32.mrf.mxu0  ;;  %v1590_v55 = vpop.f32.mrf.mxu1 }
 0x806   : > { %v1594_v56 = vadd.f32 %v1766_v53, %v1519_v54  ;;  %v1608_v25 = vadd.f32 %v2389_v58, %v1590_v55 }
 0x807   : > { %v2193_v50 = vpop.f32.mrf.mxu1  ;;  %v1521_v61 = vpop.f32.mrf.mxu0 }
 0x808   : > { %v1769_v51 = vmul.f32 -1.442695, %v1594_v56  ;;  %v1601_v62 = vadd.f32 %v1767_v60, %v1521_v61 }
 0x80a   : > { %2331 = vpow2.f32 %v1769_v51  ;;  %v1770_v45 = vmul.f32 -1.442695, %v1601_v62 }
 0x80c   : > { %2333 = vpow2.f32 %v1770_v45 }
 0x817   : > { %v2332_v20 = vpop.eup %2331 }
 0x818   : > { %v1598_v21 = vadd.f32 1.0, %v2332_v20 }
 0x819   : > { %v2334_v23 = vpop.eup %2333 }
 0x81a   : > { %2335 = vrcp.f32 %v1598_v21  ;;  %v1605_v24 = vadd.f32 1.0, %v2334_v23 }
 0x81c   : > { %2337 = vrcp.f32 %v1605_v24 }
 0x827   : > { %v2336_v26 = vpop.eup %2335 }
 0x828   : > { %v1609_v28 = vmul.f32 %v2336_v26, %v1608_v25 }
 0x829   : > { %v2338_v30 = vpop.eup %2337 }
 0x82a   : > { %v1610_v29 = vadd.f32 %v1768_v27, %v1609_v28  ;;  %v1612_v31 = vsub.f32 1.0, %v2338_v30  ;;  %v1614_v43 = vmul.f32 %v2338_v30, %v1446_v59 }
 0x82c   : > { %2339 = vtanh.f32 %v1610_v29 }
 0x839   : > { %v2340_v34 = vpop.eup %2339 }
 0x83a   : > { %v1613_v41 = vmul.f32 %v2340_v34, %v1612_v31 }
 0x83c   : > { %v1615_v46 = vadd.f32 %v1614_v43, %v1613_v41 }
 0x83e   : > { %1771 = vst [vmem:[%s2682_s28 + $0x38] sm:$0xff] %v1615_v46  ;;  %1618 = vst [vmem:[#allocation2] sm:$0xff] %v1615_v46 }
 0x83f   : > { %2457 = shalt.err (!%p2454_p12)
}
 0x840   : > { %s2458_s30 = scalar_lea.hbm %s3505_s7, 1024  ;;  %s2462_s28 = scalar_lea.hbm %s3554_s3, 2048 }
 0x841   : > { %p2459_p2 = scmp.ne.s32.totalorder %s3505_s7, %s2458_s30  ;;  %p2463_p6 = scmp.lt.s32.totalorder %s3505_s7, %s3554_s3 }
 0x842   : > { %p2464_p9 = scmp.lt.s32.totalorder %s2462_s28, %s2458_s30 }
 0x843   : > { %p2460_p1 = pnand %p2459_p2, %p3603_p7 }
 0x844   : > { %p2465_p3 = por %p2464_p9, %p2463_p6 }
 0x845   : > { %p2461_p4 = pneg %p2460_p1 }
 0x847   : > { %p2466_p5 = pnand %p2465_p3, %p2461_p4 }
 0x849   : > { %2469 = shalt.err (!%p2466_p5)
}
 0x84a   : > { %s2522_s10 = smov 128   ;;  %s2523_s21 = smov 8  }
 0x84b   : > { %2203 = dma.vmem_to_hbm [thread:$0]  (%p3603_p7), %s3507_s25, 1024, %s3505_s7, %s1620_s9, %s2522_s10, %s2522_s10, %s2523_s21  }
 0x84c PF: > { %s1648_s23 = sand.u32 1, %s2500_s12   ;;  %p3604_p8 = scmp.ne.s32.totalorder %s3573_s19, 0 }
 0x84d   : > { %p3605_p10 = scmp.ge.s32.totalorder %s2512_s15, 2  ;;  %s1649_s8 = scalar_lea.sflag [#allocation5], %s1648_s23 }
 0x84f   : > { %p2214_p11 = pnand %p3605_p10, %p3604_p8 }
 0x851   : > { %p2215_p13 = pneg %p2214_p11 }
 0x853   : > { %2495 = dma.done.wait (%p2215_p13), %s1649_s8, 1024  }
 0x854   : > { %2497 = vsyncadd (%p2215_p13), %s1649_s8, 4294966272  ;;  %p17_p0 = scmp.ge.s32.totalorder %s2599_s24, 4   ;;  %s3606_s12 = smov %s2504_s13 }
 0x855   : > { %s3607_s13 = smov %s2508_s14  ;;  %s3608_s14 = smov %s2619_s5 }
 0x856   : > { %s3609_s15 = smov %s2599_s24  ;;  %19 = sbr.rel (!%p17_p0) target bundleno = 6 (0x6), region = 99 }
 0x85b   :  { %1654 = vsyncpa [#allocation4], 1 }
 0x85c   :  { %1656 = vsyncpa [#allocation4 + $0x1], 1 }
 0x85d   :  { %1657 = vsyncpa [#allocation7], 1 }
 0x85e   :  { %1658 = vsyncpa [#allocation5], 1 }
 0x85f   :  { %1660 = vsyncpa [#allocation5 + $0x1], 1 }

</bundles_post_ra>
